<compile_context>
chip_gen: v5e
topology: v5e:2x2
jax: 0.10.0
libtpu: 0.0.40
codegen_flags: <defaults>
</compile_context>

<pallas_src>
import functools

import jax
import jax.numpy as jnp
from jax import lax
from jax.experimental import pallas as pl
from jax.experimental.pallas import tpu as pltpu

KERNEL_SIZE = 7
PAD = 3  # nn.Conv2d(1, 1, 7, padding=3, bias=False)


def _round_up(x, m):
    return (x + m - 1) // m * m


def _make_kernel(matmul_dtype, precision):
    def kernel(a_ref, x_ref, o_ref, mx_ref):
        # a_ref : (hwp, hwp)    transposed dense conv operator (y = m @ a)     [VMEM]
        # x_ref : (nb, cc, hwp) lane-dense input channel chunk                 [VMEM]
        # o_ref : (nb, 1, hwp)  lane-dense output block                        [VMEM]
        # mx_ref: (nb, hwp) f32 resident running channel-max accumulator       [VMEM scratch]
        #
        # Correctness relies on the channel axis being the innermost ("arbitrary") grid dim and the
        # a_ref / o_ref index_maps being constant across it (resident accumulator + single writeback).
        c = pl.program_id(1)
        nc = pl.num_programs(1)

        # Channel max of this chunk; lane-dense VPU work, only the (nb, hwp) result is f32.
        chunk_max = jnp.max(x_ref[...], axis=1).astype(jnp.float32)

        @pl.when(c == 0)
        def _init():
            mx_ref[...] = chunk_max

        @pl.when(c != 0)
        def _accumulate():
            mx_ref[...] = jnp.maximum(mx_ref[...], chunk_max)

        @pl.when(c == nc - 1)
        def _finalize():
            m = mx_ref[...].astype(matmul_dtype)                     # (nb, hwp)
            # Single MXU matmul: batch rides in the rows, spatial dims are lane-dense columns.
            y = jnp.dot(m, a_ref[...],
                        preferred_element_type=jnp.float32,
                        precision=precision)                         # (nb, hwp) f32
            o_ref[...] = jax.nn.sigmoid(y)[:, None, :].astype(o_ref.dtype)

    return kernel


def _conv_operator_transposed(conv_weight, H, W, hwp, dtype):
    """Dense operator T of shape (hwp, hwp) such that, for a row-major flattened plane m of shape
    (H*W,) zero-padded to hwp, (m @ T)[:H*W] equals the zero-padded 7x7 cross-correlation
    (PyTorch Conv2d semantics) of the (H, W) plane."""
    w = conv_weight.reshape(KERNEL_SIZE, KERNEL_SIZE).astype(jnp.float32)
    io = jnp.arange(H)
    ii = jnp.arange(H)
    jo = jnp.arange(W)
    jj = jnp.arange(W)
    di = ii[None, :] - io[:, None] + PAD                 # (H_out, H_in)
    dj = jj[None, :] - jo[:, None] + PAD                 # (W_out, W_in)
    vi = (di >= 0) & (di < KERNEL_SIZE)
    vj = (dj >= 0) & (dj < KERNEL_SIZE)
    a = w[jnp.clip(di, 0, KERNEL_SIZE - 1)[:, None, :, None],
          jnp.clip(dj, 0, KERNEL_SIZE - 1)[None, :, None, :]]
    a = a * (vi[:, None, :, None] & vj[None, :, None, :]).astype(jnp.float32)
    a = a.reshape(H * W, H * W)                          # A[out_flat, in_flat]
    a = jnp.pad(a, ((0, hwp - H * W), (0, hwp - H * W)))
    return a.T.astype(dtype)                             # y = m @ A.T


def _pick_channel_block(C, nb, hwp, itemsize, target_bytes):
    """Largest divisor of C whose *double-buffered, lane-padded* (nb, cc, hwp) chunk stays under
    ~target_bytes (keeps the BlockSpec pipeline inside scoped VMEM on v5e/v6e/v7x while moving
    multi-MiB steps when C*H*W allows it).  Divisor of C so no trailing channels are dropped."""
    per_channel = 2 * nb * hwp * itemsize                # x2 for double buffering
    cc = max(1, min(C, target_bytes // max(1, per_channel)))
    while C % cc:
        cc -= 1
    return cc


def spatial_attention(x, conv_weight, *, batch_block=1, channel_block=None,
                      channel_block_target_bytes=4 << 20):
    """x: (N, C, H, W), conv_weight: (1, 1, 7, 7) -> sigmoid(conv7x7(max_c x)): (N, 1, H, W)."""
    N, C, H, W = x.shape
    if N % batch_block:
        raise ValueError("batch_block must divide N")
    nb = batch_block

    HW = H * W
    hwp = _round_up(HW, 128)                             # lane-dense last axis
    if hwp > 1024:
        # TODO(synk): large-plane path (banded / shift-and-accumulate conv) not implemented;
        # the dense (HW x HW) operator is O(HW^2) memory/FLOPs and only sized for small maps.
        raise NotImplementedError("spatial_attention dense-operator path requires H*W <= 1024")

    if channel_block is not None:
        if C % channel_block:
            raise ValueError("channel_block must divide C")
        cc = channel_block
    else:
        cc = _pick_channel_block(C, nb, hwp, x.dtype.itemsize, channel_block_target_bytes)

    # Matmul operand dtype: keep half precision for bf16/f16 inputs, full f32 (HIGHEST) otherwise.
    if x.dtype == jnp.bfloat16 or x.dtype == jnp.float16:
        matmul_dtype = x.dtype
        precision = lax.Precision.DEFAULT
    else:
        matmul_dtype = jnp.float32
        precision = lax.Precision.HIGHEST

    a_t = _conv_operator_transposed(conv_weight, H, W, hwp, matmul_dtype)

    # Flatten spatial dims (free reshape) and pad the lane axis to a multiple of 128 so the
    # streaming phase uses full vregs and unmasked stores.  Padded columns are zeros and the
    # padded operator rows are zero, so they never contribute to the valid outputs.
    x_flat = x.reshape(N, C, HW)
    if hwp != HW:
        x_flat = jnp.pad(x_flat, ((0, 0), (0, 0), (0, hwp - HW)))

    # VMEM budget (padded + double-buffered) with 2x headroom, capped so it is valid on v7x.
    a_bytes = 2 * hwp * hwp * jnp.dtype(matmul_dtype).itemsize
    x_bytes = 2 * nb * _round_up(cc, 8) * hwp * x.dtype.itemsize
    o_bytes = 2 * nb * 8 * hwp * x.dtype.itemsize
    s_bytes = _round_up(nb, 8) * hwp * 4
    vmem_limit = int(min(64 << 20, max(32 << 20, 2 * (a_bytes + x_bytes + o_bytes + s_bytes))))

    out_flat = pl.pallas_call(
        _make_kernel(matmul_dtype, precision),
        out_shape=jax.ShapeDtypeStruct((N, 1, hwp), x.dtype),
        grid_spec=pltpu.PrefetchScalarGridSpec(
            num_scalar_prefetch=0,
            grid=(N // nb, C // cc),                      # channel (reduction) axis last
            in_specs=[
                pl.BlockSpec((hwp, hwp), lambda b, c: (0, 0)),          # conv operator (resident)
                pl.BlockSpec((nb, cc, hwp), lambda b, c: (b, c, 0)),    # streamed channel chunks
            ],
            out_specs=pl.BlockSpec((nb, 1, hwp), lambda b, c: (b, 0, 0)),
            scratch_shapes=[pltpu.VMEM((nb, hwp), jnp.float32)],
        ),
        compiler_params=pltpu.CompilerParams(
            # batch axis parallel (both v7x TensorCores when N >= 2); channel axis is the reduction.
            dimension_semantics=("parallel", "arbitrary"),
            vmem_limit_bytes=vmem_limit,
        ),
    )(a_t, x_flat)

    return out_flat[..., :HW].reshape(N, 1, H, W)


def _reference(x, conv_weight):
    # Pure-JAX reference (HIGHEST precision so the f32 self-test can be tight).
    m = jnp.max(x, axis=1, keepdims=True)                 # (N, 1, H, W)
    y = lax.conv_general_dilated(
        m.astype(jnp.float32), conv_weight.astype(jnp.float32),
        window_strides=(1, 1), padding=((PAD, PAD), (PAD, PAD)),
        dimension_numbers=("NCHW", "OIHW", "NCHW"),
        precision=lax.Precision.HIGHEST)
    return jax.nn.sigmoid(y).astype(x.dtype)


if __name__ == "__main__":
    key = jax.random.PRNGKey(0)
    kx, kw = jax.random.split(key)

    N, C, H, W = 2, 4, 16, 16
    x = jax.random.normal(kx, (N, C, H, W), dtype=jnp.float32)
    # Conv2d(1, 1, 7, bias=False) weight: shape (1, 1, 7, 7), deterministic init
    bound = 1.0 / (1 * KERNEL_SIZE * KERNEL_SIZE) ** 0.5
    conv_weight = jax.random.uniform(
        kw, (1, 1, KERNEL_SIZE, KERNEL_SIZE),
        minval=-bound, maxval=bound, dtype=jnp.float32)

    out = jax.block_until_ready(spatial_attention(x, conv_weight))
    ref = jax.block_until_ready(_reference(x, conv_weight))

    assert out.shape == (N, 1, H, W)
    err = float(jnp.max(jnp.abs(out.astype(jnp.float32) - ref.astype(jnp.float32))))
    # f32 path runs the MXU matmul at HIGHEST precision, so a tight tolerance is valid here.
    assert err < 1e-4, err

    print("KERNEL_OK")
</pallas_src>

<mosaic_0001>
module attributes {stable_mosaic.version = 11 : i64} {
  func.func @kernel(%arg0: i32, %arg1: i32, %arg2: memref<256x256xf32, #tpu.memory_space<vmem>>, %arg3: memref<1x4x256xf32, #tpu.memory_space<vmem>>, %arg4: memref<1x1x256xf32, #tpu.memory_space<vmem>>, %arg5: memref<1x256xf32, #tpu.memory_space<vmem>>) attributes {dimension_semantics = [#tpu.dimension_semantics<parallel>, #tpu.dimension_semantics<arbitrary>], iteration_bounds = array<i64: 2, 1>, scalar_prefetch = 0 : i64, scratch_operands = 1 : i64, tpu.core_type = #tpu.core_type<tc>, window_params = [{pipeline_mode = #tpu.pipeline_mode<synchronous>, transform_indices = @transform_0, window_bounds = array<i64: 256, 256>}, {transform_indices = @transform_1, window_bounds = array<i64: 1, 4, 256>}, {transform_indices = @transform_2, window_bounds = array<i64: 1, 1, 256>}]} {
    %c0 = arith.constant 0 : index
    %c0_0 = arith.constant 0 : index
    %c0_1 = arith.constant 0 : index
    %0 = vector.load %arg3[%c0, %c0_0, %c0_1] : memref<1x4x256xf32, #tpu.memory_space<vmem>>, vector<1x4x256xf32>
    %cst = arith.constant dense<0xFF800000> : vector<1x256xf32>
    %1 = vector.multi_reduction <maximumf>, %0, %cst [1] : vector<1x4x256xf32> to vector<1x256xf32>
    %c0_i32 = arith.constant 0 : i32
    %2 = arith.cmpi eq, %arg1, %c0_i32 : i32
    %3 = arith.extui %2 : i1 to i32
    %c0_i32_2 = arith.constant 0 : i32
    %4 = arith.cmpi ne, %3, %c0_i32_2 : i32
    scf.if %4 {
      %c0_7 = arith.constant 0 : index
      %c0_8 = arith.constant 0 : index
      %11 = vector.load %arg5[%c0_7, %c0_8] : memref<1x256xf32, #tpu.memory_space<vmem>>, vector<1x256xf32>
      tpu.vector_store %arg5[%c0_7, %c0_8], %1 {strides = array<i32>} : memref<1x256xf32, #tpu.memory_space<vmem>>, vector<1x256xf32>,
    } else {
    }
    %c0_i32_3 = arith.constant 0 : i32
    %5 = arith.cmpi ne, %arg1, %c0_i32_3 : i32
    %6 = arith.extui %5 : i1 to i32
    %c0_i32_4 = arith.constant 0 : i32
    %7 = arith.cmpi ne, %6, %c0_i32_4 : i32
    scf.if %7 {
      %c0_7 = arith.constant 0 : index
      %c0_8 = arith.constant 0 : index
      %11 = vector.load %arg5[%c0_7, %c0_8] : memref<1x256xf32, #tpu.memory_space<vmem>>, vector<1x256xf32>
      %12 = arith.maximumf %11, %1 : vector<1x256xf32>
      %c0_9 = arith.constant 0 : index
      %c0_10 = arith.constant 0 : index
      %13 = vector.load %arg5[%c0_9, %c0_10] : memref<1x256xf32, #tpu.memory_space<vmem>>, vector<1x256xf32>
      tpu.vector_store %arg5[%c0_9, %c0_10], %12 {strides = array<i32>} : memref<1x256xf32, #tpu.memory_space<vmem>>, vector<1x256xf32>,
    } else {
    }
    %c0_i32_5 = arith.constant 0 : i32
    %8 = arith.cmpi eq, %arg1, %c0_i32_5 : i32
    %9 = arith.extui %8 : i1 to i32
    %c0_i32_6 = arith.constant 0 : i32
    %10 = arith.cmpi ne, %9, %c0_i32_6 : i32
    scf.if %10 {
      %c0_7 = arith.constant 0 : index
      %c0_8 = arith.constant 0 : index
      %11 = vector.load %arg5[%c0_7, %c0_8] : memref<1x256xf32, #tpu.memory_space<vmem>>, vector<1x256xf32>
      %c0_9 = arith.constant 0 : index
      %c0_10 = arith.constant 0 : index
      %12 = vector.load %arg2[%c0_9, %c0_10] : memref<256x256xf32, #tpu.memory_space<vmem>>, vector<256x256xf32>
      %cst_11 = arith.constant dense<0.000000e+00> : vector<1x256xf32>
      %13 = tpu.matmul %11, %12, %cst_11 {dimension_numbers = #tpu.dot_dimension_numbers<[1], [0], [0], [1], [0, 0, 1, 1], [], []>, precision = #tpu.contract_precision<fp32>} : vector<1x256xf32>, vector<256x256xf32>, vector<1x256xf32> -> vector<1x256xf32>
      %14 = arith.negf %13 : vector<1x256xf32>
      %15 = math.exp %14 : vector<1x256xf32>
      %cst_12 = arith.constant 1.000000e+00 : f32
      %16 = vector.broadcast %cst_12 : f32 to vector<1x256xf32>
      %17 = arith.addf %16, %15 : vector<1x256xf32>
      %18 = arith.divf %16, %17 : vector<1x256xf32>
      %19 = vector.shape_cast %18 : vector<1x256xf32> to vector<1x1x256xf32>
      %c0_13 = arith.constant 0 : index
      %c0_14 = arith.constant 0 : index
      %c0_15 = arith.constant 0 : index
      %20 = vector.load %arg4[%c0_13, %c0_14, %c0_15] : memref<1x1x256xf32, #tpu.memory_space<vmem>>, vector<1x1x256xf32>
      tpu.vector_store %arg4[%c0_13, %c0_14, %c0_15], %19 {strides = array<i32>} : memref<1x1x256xf32, #tpu.memory_space<vmem>>, vector<1x1x256xf32>,
    } else {
    }
    return
  }
  func.func @transform_0(%arg0: i32, %arg1: i32) -> (i32, i32) {
    %c0_i32 = arith.constant 0 : i32
    %c0_i32_0 = arith.constant 0 : i32
    %c0_i32_1 = arith.constant 0 : i32
    return %c0_i32, %c0_i32_0 : i32, i32
  }
  func.func @transform_1(%arg0: i32, %arg1: i32) -> (i32, i32, i32) {
    %c0_i32 = arith.constant 0 : i32
    %c0_i32_0 = arith.constant 0 : i32
    return %arg0, %arg1, %c0_i32 : i32, i32, i32
  }
  func.func @transform_2(%arg0: i32, %arg1: i32) -> (i32, i32, i32) {
    %c0_i32 = arith.constant 0 : i32
    %c0_i32_0 = arith.constant 0 : i32
    %c0_i32_1 = arith.constant 0 : i32
    return %arg0, %c0_i32, %c0_i32_0 : i32, i32, i32
  }
}

</mosaic_0001>

<bundles_post_ra>
// kernel: tpu_custom_call.1
= control target key start
LH: loop header
LB: loop body
LE: loop exit
PB: predicated region body
PF: predicated region fallthrough
CT: control target
= control target key end

     0   :  { %7 = vsyncpa [#allocation4], 0  ;;  %s3279_s0 = inlined_call_operand.hbm [shape: f32[256,256], index: 0, kind: input, shape index: {}]   ;;  %s3280_s1 = inlined_call_operand.hbm [shape: f32[2,4,256], index: 1, kind: input, shape index: {}]   ;;  %s3281_s2 = inlined_call_operand.hbm [shape: f32[2,1,256], index: 2, kind: output, shape index: {}]  }
   0x1   :  { %8 = vsyncpa [#allocation7], 0 }
   0x2   :  { %10 = vsyncpa [#allocation7 + $0x1], 0 }
   0x3   :  { %11 = vsyncpa [#allocation5], 0 }
   0x4   :  { %13 = vsyncpa [#allocation5 + $0x1], 0  ;;  %s2112_s9 = smov 0   ;;  %s2114_s10 = smov 0  }
   0x5   :  { %s2116_s11 = smov 0   ;;  %s2118_s12 = smov 0  }
   0x6   :  { %s2120_s13 = smov 0   ;;  %s2122_s14 = smov 0  }
   0x7 LB: > { %s1844_s15 = sadd.s32 4294967295, %s2092_s14   ;;  %p1846_p0 = scmp.ge.s32.totalorder %s2092_s14, 1  ;;  %s2092_s14 = sphi %s2122_s14, %s19_s14   ;;  %s2088_s13 = sphi %s2120_s13, %s3449_s13   ;;  %s2084_s12 = sphi %s2118_s12, %s3448_s12   ;;  %s2080_s11 = sphi %s2116_s11, %s3447_s11   ;;  %s2076_s10 = sphi %s2114_s10, %s3446_s10   ;;  %s2072_s9 = sphi %s2112_s9, %s3445_s9  }
   0x8   : > { %p2144_p1 = scmp.eq.s32.totalorder %s1844_s15, 0  ;;  %p111_p2 = scmp.lt.s32.totalorder %s2092_s14, 3 }
   0x9   : > { %s122_s19 = sshll.u32 %s3279_s0, 4  ;;  %s2094_s21 = smov [#allocation3]   ;;  %s123_s19 = int_to_ptr.hbm [resolvable:$true] %s122_s19 }
   0xa   : > { %p2152_p3 = pnand %p1846_p0, %p111_p2  ;;  %s124_s22 = sshll.u32 %s2094_s21, 4  ;;  %s125_s22 = int_to_ptr.vmem [resolvable:$true] %s124_s22 }
   0xb   : > { %p1848_p6 = scmp.ge.s32.totalorder %s2092_s14, 2  ;;  %s2095_s23 = smov 256  }
   0xc   : > { %p1871_p4 = pneg %p2152_p3  ;;  %s2096_s24 = smov 16  }
   0xd   : > { %s1845_s25 = sadd.s32 4294967294, %s2092_s14   ;;  %s31_s26 = sadd.s32 1, %s2088_s13 }
   0xe   : > { %p1872_p5 = pnand %p1871_p4, %p2144_p1  ;;  %s61_s27 = sadd.s32 1, %s2080_s11 }
   0xf   : > { %p33_p7 = scmp.ge.s32.totalorder %s31_s26, 2  ;;  %p68_p8 = scmp.ne.s32.totalorder %s2080_s11, %s2076_s10 }
  0x10   : > { %1874 = dma.hbm_to_vmem [thread:$0]  (!%p1872_p5), %s123_s19, 8192, %s125_s22, [#allocation4], %s2095_s23, %s2095_s23, %s2096_s24  }
  0x11   : > { %p69_p9 = scmp.eq.s32.totalorder %s2092_s14, 0  ;;  %p74_p10 = scmp.ne.s32.totalorder %s2076_s10, %s2072_s9 }
  0x12   : > { %s3451_s26 = smov (%p33_p7, %s31_s26), 0  ;;  %p98_p13 = scmp.eq.s32.totalorder %s1844_s15, 1 }
  0x13   : > { %p2171_p11 = por %p69_p9, %p68_p8  ;;  %p2177_p12 = por %p2144_p1, %p74_p10 }
  0x14   : > { %s56_s30 = ssub.s32 %s2088_s13, %s3451_s26  ;;  %p104_p2 = scmp.eq.s32.totalorder %s1845_s25, 1 }
  0x15   : > { %p59_p0 = scmp.eq.s32.totalorder %s56_s30, 0  ;;  %p2183_p4 = por %p98_p13, %p68_p8 }
  0x16   : > { %p1884_p5 = scmp.lt.s32.totalorder %s2092_s14, 2  ;;  %p2191_p7 = por %p104_p2, %p74_p10 }
  0x17   : > { %s2189_s4 = scalar_select %p59_p0, %s2080_s11, %s61_s27  }
  0x18   : > { %s138_s6 = sand.u32 1, %s2080_s11   ;;  %s1862_s8 = sshll.u32 %s2088_s13, 3 }
  0x19   : > { %s1849_s7 = sshll.u32 %s138_s6, 3  ;;  %s149_s15 = scalar_lea.hbm %s3280_s1, %s1862_s8 }
  0x1a   : > { %s142_s19 = scalar_lea.vmem [#allocation6], %s1849_s7  ;;  %s151_s22 = sshll.u32 %s149_s15, 4  ;;  %s152_s22 = int_to_ptr.hbm [resolvable:$true] %s151_s22 }
  0x1b   : > { %s153_s21 = sshll.u32 %s142_s19, 4  ;;  %p1876_p8 = pnand %p1884_p5, %p2171_p11  ;;  %s154_s21 = int_to_ptr.vmem [resolvable:$true] %s153_s21 }
  0x1c   : > { %s139_s23 = scalar_lea.sflag [#allocation7], %s138_s6  ;;  %162 = sbr.rel (%p2152_p3) target bundleno = 415 (0x19f), region = 28 }
  0x1d   : > { %1878 = dma.hbm_to_vmem [thread:$0]  (!%p1876_p8), %s152_s22, 128, %s154_s21, %s139_s23  }
  0x21   : > { %2059 = dma.done.wait (%p2144_p1), [#allocation4], 8192  }
  0x22   : > { %2061 = vsyncadd (%p2144_p1), [#allocation4], 4294959104  ;;  %s2209_s24 = sand.u32 1, %s2076_s10  }
  0x23   : > { %s1854_s25 = sshll.u32 %s2209_s24, 3  ;;  %s170_s27 = scalar_lea.sflag [#allocation7], %s2209_s24 }
  0x24   : > { %s2213_s28 = scalar_lea.vmem [#allocation6], %s1854_s25 }
  0x25   : > { %2063 = dma.done.wait (%p2177_p12), %s170_s27, 128  }
  0x26   : > { %2065 = vsyncadd (%p2177_p12), %s170_s27, 4294967168  ;;  %v283_v0 = vld [vmem:[#allocation3 + $0xf0] sm:$0xff]  ;;  %v281_v1 = vld [vmem:[#allocation3 + $0xe0] sm:$0xff]  ;;  %vm202_vm0 = vcmask 1043456   ;;  %vm224_vm1 = vcmask 1040384   ;;  %s1855_s16 = sshll.u32 %s2209_s24, 1 }
  0x27   : > { %v279_v2 = vld [vmem:[#allocation3 + $0xd0] sm:$0xff]  ;;  %v2219_v3 = vand.u32 4294901760, %v283_v0  ;;  %v2221_v4 = vand.u32 4294901760, %v281_v1  ;;  %v277_v6 = vld [vmem:[#allocation3 + $0xc0] sm:$0xff]  ;;  %s1859_s20 = sshll.u32 %s2084_s12, 1  ;;  %s194_s12 = scalar_lea.vmem [#allocation8], %s1855_s16 }
  0x28   : > { %v2223_v5 = vand.u32 4294901760, %v279_v2  ;;  %v275_v7 = vld [vmem:[#allocation3 + $0xb0] sm:$0xff]  ;;  %v273_v8 = vld [vmem:[#allocation3 + $0xa0] sm:$0xff]  ;;  %v2225_v9 = vand.u32 4294901760, %v277_v6  ;;  %s1746_s6 = scalar_lea.hbm %s3281_s2, %s1859_s20  ;;  %s1748_s7 = sshll.u32 %s194_s12, 4  ;;  %s1749_s7 = int_to_ptr.vmem [resolvable:$true] %s1748_s7 }
  0x29   : > { %v2227_v10 = vand.u32 4294901760, %v275_v7  ;;  %v2229_v11 = vand.u32 4294901760, %v273_v8  ;;  %v271_v12 = vld [vmem:[#allocation3 + $0x90] sm:$0xff]  ;;  %v269_v13 = vld [vmem:[#allocation3 + $0x80] sm:$0xff]  ;;  %323 = vmatpush.msra.mxu0 %v2219_v3  ;;  %v2233_v14 = vsub.f32 %v283_v0, %v2219_v3  ;;  %v2236_v15 = vsub.f32 %v281_v1, %v2221_v4  ;;  %519 = vmatpush.msra.mxu3 %v2219_v3  ;;  %s1750_s8 = sshll.u32 %s1746_s6, 4  ;;  %s1736_s17 = scalar_lea.sflag [#allocation5], %s2209_s24  ;;  %s1751_s8 = int_to_ptr.hbm [resolvable:$true] %s1750_s8 }
  0x2a   : > { %v2240_v16 = vsub.f32 %v279_v2, %v2223_v5  ;;  %v2242_v17 = vand.u32 4294901760, %v271_v12  ;;  %v267_v18 = vld [vmem:[#allocation3 + $0x70] sm:$0xff]  ;;  %v2245_v19 = vsub.f32 %v277_v6, %v2225_v9  ;;  %v2258_v25 = vand.u32 4294901760, %v269_v13  ;;  %v265_v26 = vld [vmem:[#allocation3 + $0x60] sm:$0xff]  ;;  %s2020_s18 = sshra.s32 %s1751_s8, 4  ;;  %s2026_s22 = scalar_lea.hbm %s3281_s2, 4  ;;  %s2021_s18 = int_to_ptr.hbm [resolvable:$true] %s2020_s18 }
  0x2b   : > { %v2248_v20 = vsub.f32 %v275_v7, %v2227_v10  ;;  %v2251_v21 = vsub.f32 %v273_v8, %v2229_v11  ;;  %325 = vmatpush.msra.mxu0 %v2221_v4  ;;  %466 = vmatpush.msra.mxu2 %v2233_v14  ;;  %v365_v22 = vand.u32 4294901760, %v2233_v14  ;;  %v3297_v23 = vand.u32 4294901760, %v2236_v15  ;;  %v263_v34 = vld [vmem:[#allocation3 + $0x50] sm:$0xff]  ;;  %v195_v35 = vld [vmem:[%s2213_s28] sm:$0xff]  ;;  %s2022_s15 = scalar_lea.hbm %s2021_s18, 2  ;;  %p2027_p10 = scmp.lt.s32.totalorder %s2021_s18, %s3281_s2 }
  0x2c   : > { %v3295_v24 = vand.u32 4294901760, %v2240_v16  ;;  %521 = vmatpush.msra.mxu3 %v2221_v4  ;;  %v3292_v27 = vand.u32 4294901760, %v2245_v19  ;;  %v2262_v28 = vand.u32 4294901760, %v267_v18  ;;  %v2265_v29 = vsub.f32 %v271_v12, %v2242_v17  ;;  %197 = vst [vmem:[#allocation1] ss:$2 sm:$0xff] %v195_v35  ;;  %v261_v43 = vld [vmem:[#allocation3 + $0x40] sm:$0xff]  ;;  %p2023_p1 = scmp.ne.s32.totalorder %s2021_s18, %s2022_s15  ;;  %p2028_p11 = scmp.lt.s32.totalorder %s2026_s22, %s2022_s15 }
  0x2d   : > { %327 = vmatpush.msra.mxu0 %v2223_v5  ;;  %469 = vmatpush.msra.mxu2 %v2236_v15  ;;  %v366_v30 = vsub.f32 %v2233_v14, %v365_v22  ;;  %v372_v31 = vsub.f32 %v2236_v15, %v3297_v23  ;;  %v3291_v33 = vand.u32 4294901760, %v2248_v20  ;;  %v2281_v36 = vand.u32 4294901760, %v265_v26  ;;  %v259_v49 = vld [vmem:[#allocation3 + $0x30] sm:$0xff]  ;;  %v257_v55 = vld [vmem:[#allocation3 + $0x20] sm:$0xff] }
  0x2e   : > { %v378_v32 = vsub.f32 %v2240_v16, %v3295_v24  ;;  %523 = vmatpush.msra.mxu3 %v2223_v5  ;;  %v3289_v37 = vand.u32 4294901760, %v2251_v21  ;;  %v384_v40 = vsub.f32 %v2245_v19, %v3292_v27  ;;  %v2290_v41 = vsub.f32 %v269_v13, %v2258_v25  ;;  %v255_v60 = vld [vmem:[#allocation3 + $0x10] sm:$0xff]  ;;  %v313_v63 = vld [vmem:[#allocation3 + $0x1e0] sm:$0xff]  ;;  %p2024_p3 = pnand %p2023_p1, %p2183_p4  ;;  %p2029_p12 = por %p2028_p11, %p2027_p10 }
  0x2f   : > { %329 = vmatpush.msra.mxu0 %v2225_v9  ;;  %v367_v38 = vand.u32 4294901760, %v366_v30  ;;  %472 = vmatpush.msra.mxu2 %v2240_v16  ;;  %v373_v39 = vand.u32 4294901760, %v372_v31  ;;  %v2293_v42 = vand.u32 4294901760, %v263_v34  ;;  %v390_v45 = vsub.f32 %v2248_v20, %v3291_v33  ;;  %v315_v61 = vld [vmem:[#allocation3 + $0x1f0] sm:$0xff]  ;;  %v253_v7 = vld [vmem:[#allocation3] sm:$0xff] }
  0x30   : > { %525 = vmatpush.msra.mxu3 %v2225_v9  ;;  %v379_v44 = vand.u32 4294901760, %v378_v32  ;;  %v3288_v46 = vand.u32 4294901760, %v2265_v29  ;;  %v2301_v47 = vsub.f32 %v267_v18, %v2262_v28  ;;  %v396_v48 = vsub.f32 %v2251_v21, %v3289_v37  ;;  %v297_v23 = vld [vmem:[#allocation3 + $0x160] sm:$0xff]  ;;  %p2025_p9 = pneg %p2024_p3 }
  0x31   : > { %331 = vmatpush.msra.mxu0 %v2227_v10  ;;  %368 = vmatpush.msra.mxu1 %v367_v38  ;;  %v385_v50 = vand.u32 4294901760, %v384_v40  ;;  %v2309_v51 = vand.u32 4294901760, %v261_v43  ;;  %v3287_v52 = vand.u32 4294901760, %v2290_v41  ;;  %v2313_v53 = vsub.f32 %v265_v26, %v2281_v36 }
  0x32   : > { %475 = vmatpush.msra.mxu2 %v2245_v19  ;;  %527 = vmatpush.msra.mxu3 %v2227_v10  ;;  %v2318_v54 = vsub.f32 %v263_v34, %v2293_v42  ;;  %v391_v56 = vand.u32 4294901760, %v390_v45  ;;  %v402_v57 = vsub.f32 %v2265_v29, %v3288_v46  ;;  %v2324_v58 = vand.u32 4294901760, %v259_v49  ;;  %v311_v34 = vld [vmem:[#allocation3 + $0x1d0] sm:$0xff]  ;;  %v301_v46 = vld [vmem:[#allocation3 + $0x180] sm:$0xff]  ;;  %p2030_p13 = pnand %p2029_p12, %p2025_p9 }
  0x33   : > { %333 = vmatpush.msra.mxu0 %v2229_v11  ;;  %374 = vmatpush.msra.mxu1 %v373_v39  ;;  %v3285_v59 = vand.u32 4294901760, %v2301_v47  ;;  %v397_v62 = vand.u32 4294901760, %v396_v48  ;;  %v408_v0 = vsub.f32 %v2290_v41, %v3287_v52  ;;  %v2333_v1 = vand.u32 4294901760, %v257_v55  ;;  %v309_v48 = vld [vmem:[#allocation3 + $0x1c0] sm:$0xff] }
  0x34   : > { %478 = vmatpush.msra.mxu2 %v2248_v20  ;;  %529 = vmatpush.msra.mxu3 %v2229_v11  ;;  %v3284_v2 = vand.u32 4294901760, %v2313_v53  ;;  %v2337_v6 = vsub.f32 %v261_v43, %v2309_v51  ;;  %v2341_v8 = vand.u32 4294901760, %v255_v60  ;;  %v3282_v12 = vand.u32 4294901760, %v2318_v54  ;;  %v198_v24 = vld.sshfl [vmem:[#allocation1] sm:$0xff pattern:$0x75316420] }
  0x35   : > { %335 = vmatpush.msra.mxu0 %v2242_v17  ;;  %380 = vmatpush.msra.mxu1 %v379_v44  ;;  %v2344_v13 = vand.u32 4294901760, %v315_v61  ;;  %v403_v18 = vand.u32 4294901760, %v402_v57  ;;  %v414_v26 = vsub.f32 %v2301_v47, %v3285_v59  ;;  %v2351_v30 = vsub.f32 %v259_v49, %v2324_v58  ;;  %v199_v33 = vld.sshfl [vmem:[#allocation1 + $0x8] sm:$0xff pattern:$0x75316420] }
  0x36   : > { %481 = vmatpush.msra.mxu2 %v2251_v21  ;;  %531 = vmatpush.msra.mxu3 %v2242_v17  ;;  %3350 = vst [vmem:[#allocation12_spill] sm:$0xff] %v2341_v8  ;;  %v2353_v31 = vand.u32 4294901760, %v313_v63  ;;  %v2357_v32 = vand.u32 4294901760, %v253_v7  ;;  %v409_v35 = vand.u32 4294901760, %v408_v0  ;;  %v420_v38 = vsub.f32 %v2313_v53, %v3284_v2  ;;  %v303_v2 = vld [vmem:[#allocation3 + $0x190] sm:$0xff] }
  0x37   : > { %337 = vmatpush.msra.mxu0 %v2258_v25  ;;  %386 = vmatpush.msra.mxu1 %v385_v50  ;;  %3351 = vst [vmem:[#allocation13_spill] sm:$0xff] %v2344_v13  ;;  %v3283_v39 = vand.u32 4294901760, %v2337_v6  ;;  %v2365_v40 = vsub.f32 %v257_v55, %v2333_v1  ;;  %v426_v43 = vsub.f32 %v2318_v54, %v3282_v12  ;;  %v415_v49 = vand.u32 4294901760, %v414_v26  ;;  %v305_v12 = vld [vmem:[#allocation3 + $0x1a0] sm:$0xff] }
  0x38   : > { %484 = vmatpush.msra.mxu2 %v2265_v29  ;;  %533 = vmatpush.msra.mxu3 %v2258_v25  ;;  %3352 = vst [vmem:[#allocation14_spill] sm:$0xff] %v2357_v32  ;;  %v2373_v44 = vsub.f32 %v255_v60, %v2341_v8  ;;  %v2376_v45 = vsub.f32 %v315_v61, %v2344_v13  ;;  %v3286_v50 = vand.u32 4294901760, %v2351_v30  ;;  %v2380_v55 = vand.u32 4294901760, %v311_v34  ;;  %v307_v60 = vld [vmem:[#allocation3 + $0x1b0] sm:$0xff] }
  0x39   : > { %339 = vmatpush.msra.mxu0 %v2262_v28  ;;  %392 = vmatpush.msra.mxu1 %v391_v56  ;;  %v2383_v56 = vsub.f32 %v313_v63, %v2353_v31  ;;  %v2388_v57 = vsub.f32 %v253_v7, %v2357_v32  ;;  %v421_v61 = vand.u32 4294901760, %v420_v38  ;;  %v3290_v0 = vand.u32 4294901760, %v2365_v40 }
  0x3a   : > { %487 = vmatpush.msra.mxu2 %v2290_v41  ;;  %535 = vmatpush.msra.mxu3 %v2262_v28  ;;  %3353 = vst [vmem:[#allocation15_spill] sm:$0xff] %v2376_v45  ;;  %v2395_v63 = vand.u32 4294901760, %v309_v48  ;;  %v3293_v7 = vand.u32 4294901760, %v2373_v44  ;;  %v3294_v26 = vand.u32 4294901760, %v2376_v45  ;;  %v2421_v52 = vand.u32 4294901760, %v305_v12 }
  0x3b   : > { %341 = vmatpush.msra.mxu0 %v2281_v36  ;;  %398 = vmatpush.msra.mxu1 %v397_v62  ;;  %3354 = vst [vmem:[#allocation16_spill] sm:$0xff] %v2383_v56  ;;  %v432_v62 = vsub.f32 %v2337_v6, %v3283_v39  ;;  %v3296_v38 = vand.u32 4294901760, %v2383_v56  ;;  %v2407_v39 = vsub.f32 %v311_v34, %v2380_v55  ;;  %v3301_v59 = vand.u32 4294901760, %v2388_v57 }
  0x3c   : > { %490 = vmatpush.msra.mxu2 %v2301_v47  ;;  %537 = vmatpush.msra.mxu3 %v2281_v36  ;;  %v2419_v34 = vsub.f32 %v309_v48, %v2395_v63  ;;  %v450_v37 = vsub.f32 %v2373_v44, %v3293_v7  ;;  %v299_v7 = vld [vmem:[#allocation3 + $0x170] sm:$0xff] }
  0x3d   : > { %343 = vmatpush.msra.mxu0 %v2293_v42  ;;  %404 = vmatpush.msra.mxu1 %v403_v18  ;;  %v427_v18 = vand.u32 4294901760, %v426_v43  ;;  %3355 = vst [vmem:[#allocation17_spill] sm:$0xff] %v2407_v39  ;;  %v2409_v43 = vand.u32 4294901760, %v307_v60 }
  0x3e   : > { %493 = vmatpush.msra.mxu2 %v2313_v53  ;;  %539 = vmatpush.msra.mxu3 %v2293_v42  ;;  %3356 = vst [vmem:[#allocation18_spill] sm:$0xff] %v2419_v34  ;;  %v3359_v14 = vand.u32 4294901760, %v2419_v34 }
  0x3f   : > { %345 = vmatpush.msra.mxu0 %v2309_v51  ;;  %410 = vmatpush.msra.mxu1 %v409_v35  ;;  %v438_v35 = vsub.f32 %v2351_v30, %v3286_v50  ;;  %v444_v50 = vsub.f32 %v2365_v40, %v3290_v0  ;;  %v713_v0 = vsub.f32 %v2383_v56, %v3296_v38  ;;  %v451_v56 = vand.u32 4294901760, %v450_v37 }
  0x40   : > { %496 = vmatpush.msra.mxu2 %v2318_v54  ;;  %541 = vmatpush.msra.mxu3 %v2309_v51  ;;  %v2439_v27 = vsub.f32 %v307_v60, %v2409_v43  ;;  %v2451_v38 = vsub.f32 %v305_v12, %v2421_v52  ;;  %v3357_v12 = vand.u32 4294901760, %v2407_v39  ;;  %v3358_v37 = vand.u32 4294901760, %v2236_v15 }
  0x41   : > { %347 = vmatpush.msra.mxu0 %v2324_v58  ;;  %416 = vmatpush.msra.mxu1 %v415_v49  ;;  %v433_v49 = vand.u32 4294901760, %v432_v62  ;;  %v2431_v62 = vand.u32 4294901760, %v303_v2  ;;  %v439_v48 = vand.u32 4294901760, %v438_v35  ;;  %v456_v35 = vsub.f32 %v2388_v57, %v3301_v59 }
  0x42   : > { %499 = vmatpush.msra.mxu2 %v2337_v6  ;;  %543 = vmatpush.msra.mxu3 %v2324_v58  ;;  %v714_v59 = vand.u32 4294901760, %v713_v0  ;;  %v719_v60 = vsub.f32 %v2407_v39, %v3357_v12  ;;  %v3361_v15 = vand.u32 4294901760, %v2439_v27 }
  0x43   : > { %349 = vmatpush.msra.mxu0 %v2333_v1  ;;  %422 = vmatpush.msra.mxu1 %v421_v61  ;;  %v707_v61 = vsub.f32 %v2376_v45, %v3294_v26  ;;  %v2443_v26 = vand.u32 4294901760, %v301_v46  ;;  %v203_v45 = vsel %vm202_vm0, %v198_v24, -inf  ;;  %v457_v12 = vand.u32 4294901760, %v456_v35 }
  0x44   : > { %502 = vmatpush.msra.mxu2 %v2351_v30  ;;  %545 = vmatpush.msra.mxu3 %v2333_v1  ;;  %v204_v0 = vrot.slane %v203_v45, 4  ;;  %v725_v24 = vsub.f32 %v2419_v34, %v3359_v14  ;;  %v720_v14 = vand.u32 4294901760, %v719_v60  ;;  %v731_v34 = vsub.f32 %v2439_v27, %v3361_v15 }
  0x45   : > { %351 = vmatpush.msra.mxu0 %v2341_v8  ;;  %428 = vmatpush.msra.mxu1 %v427_v18  ;;  %v445_v18 = vand.u32 4294901760, %v444_v50  ;;  %v2457_v50 = vsub.f32 %v303_v2, %v2431_v62  ;;  %v2471_v2 = vsub.f32 %v301_v46, %v2443_v26  ;;  %v3360_v46 = vand.u32 4294901760, %v2240_v16 }
  0x46   : > { %505 = vmatpush.msra.mxu2 %v2365_v40  ;;  %547 = vmatpush.msra.mxu3 %v2341_v8  ;;  %v708_v8 = vand.u32 4294901760, %v707_v61  ;;  %v2473_v61 = vand.u32 4294901760, %v297_v23  ;;  %v205_v35 = vmax.f32 %v203_v45, %v204_v0  ;;  %v3362_v16 = vand.u32 4294901760, %v2245_v19  ;;  %v291_v45 = vld [vmem:[#allocation3 + $0x130] sm:$0xff] }
  0x47   : > { %353 = vmatpush.msra.mxu0 %v2357_v32  ;;  %434 = vmatpush.msra.mxu1 %v433_v49  ;;  %v2459_v49 = vand.u32 4294901760, %v299_v7  ;;  %v726_v60 = vand.u32 4294901760, %v725_v24  ;;  %v3363_v0 = vand.u32 4294901760, %v2451_v38  ;;  %v289_v24 = vld [vmem:[#allocation3 + $0x120] sm:$0xff] }
  0x48   : > { %508 = vmatpush.msra.mxu2 %v2373_v44  ;;  %549 = vmatpush.msra.mxu3 %v2357_v32  ;;  %v3312_v32 = vand.u32 4294901760, %v2457_v50 }
  0x49   : > { %560 = vmatpush.msrb.mxu0 %v365_v22  ;;  %440 = vmatpush.msra.mxu1 %v439_v48  ;;  %v295_v22 = vld [vmem:[#allocation3 + $0x150] sm:$0xff]  ;;  %v210_v48 = vsel %vm202_vm0, %v199_v33, -inf  ;;  %v2485_v33 = vsub.f32 %v299_v7, %v2459_v49  ;;  %v2497_v7 = vsub.f32 %v297_v23, %v2473_v61 }
  0x4a   : > { %511 = vmatpush.msra.mxu2 %v2388_v57  ;;  %v211_v39 = vrot.slane %v210_v48, 4  ;;  %709 = vmatpush.msrb.mxu3 %v708_v8  ;;  %v3311_v8 = vand.u32 4294901760, %v2471_v2  ;;  %v743_v23 = vsub.f32 %v2457_v50, %v3312_v32  ;;  %v285_v32 = vld [vmem:[#allocation3 + $0x100] sm:$0xff] }
  0x4b   : > { %564 = vmatpush.msrb.mxu0 %v3358_v37  ;;  %446 = vmatpush.msra.mxu1 %v445_v18  ;;  %v293_v37 = vld [vmem:[#allocation3 + $0x140] sm:$0xff]  ;;  %v2487_v18 = vand.u32 4294901760, %v295_v22 }
  0x4c   : > { %664 = vmatpush.msrb.mxu2 %v2344_v13  ;;  %v212_v13 = vmax.f32 %v210_v48, %v211_v39  ;;  %715 = vmatpush.msrb.mxu3 %v714_v59  ;;  %v737_v39 = vsub.f32 %v2451_v38, %v3363_v0  ;;  %v3364_v59 = vand.u32 4294901760, %v2248_v20  ;;  %v3313_v48 = vand.u32 4294901760, %v2485_v33 }
  0x4d   : > { %568 = vmatpush.msrb.mxu0 %v3360_v46  ;;  %452 = vmatpush.msra.mxu1 %v451_v56  ;;  %v2499_v46 = vand.u32 4294901760, %v293_v37  ;;  %v206_v56 = vrot.slane %v205_v35, 2  ;;  %v2516_v0 = vand.u32 4294901760, %v291_v45 }
  0x4e   : > { %666 = vmatpush.msrb.mxu2 %v2353_v31  ;;  %v213_v19 = vrot.slane %v212_v13, 2  ;;  %721 = vmatpush.msrb.mxu3 %v720_v14  ;;  %v287_v14 = vld [vmem:[#allocation3 + $0x110] sm:$0xff] }
  0x4f   : > { %572 = vmatpush.msrb.mxu0 %v3362_v16  ;;  %458 = vmatpush.msra.mxu1 %v457_v12  ;;  %v2513_v12 = vsub.f32 %v295_v22, %v2487_v18  ;;  %v207_v15 = vmax.f32 %v205_v35, %v206_v56  ;;  %v732_v16 = vand.u32 4294901760, %v731_v34  ;;  %v2526_v35 = vsub.f32 %v293_v37, %v2499_v46 }
  0x50   : > { %668 = vmatpush.msrb.mxu2 %v2380_v55  ;;  %v214_v20 = vmax.f32 %v212_v13, %v213_v19  ;;  %727 = vmatpush.msrb.mxu3 %v726_v60  ;;  %v738_v13 = vand.u32 4294901760, %v737_v39  ;;  %v2529_v34 = vand.u32 4294901760, %v289_v24  ;;  %v227_v19 = vlaneseq }
  0x51   : > { %576 = vmatpush.msrb.mxu0 %v3364_v59  ;;  %627 = vmatpush.msrb.mxu1 %v2219_v3  ;;  %v3365_v3 = vand.u32 4294901760, %v2251_v21  ;;  %v749_v59 = vsub.f32 %v2471_v2, %v3311_v8  ;;  %v208_v56 = vrot.slane %v207_v15, 1  ;;  %v755_v37 = vsub.f32 %v2485_v33, %v3313_v48 }
  0x52   : > { %670 = vmatpush.msrb.mxu2 %v2395_v63  ;;  %v215_v21 = vrot.slane %v214_v20, 1  ;;  %733 = vmatpush.msrb.mxu3 %v732_v16  ;;  %v2540_v60 = vsub.f32 %v291_v45, %v2516_v0  ;;  %v772_v8 = vand.u32 4294901760, %v2526_v35  ;;  %vm2552_vm2 = vcmp.lt.s32.totalorder %v227_v19, 256 }
  0x53   : > { %580 = vmatpush.msrb.mxu0 %v3365_v3  ;;  %629 = vmatpush.msrb.mxu1 %v2221_v4  ;;  %v3366_v4 = vand.u32 4294901760, %v2265_v29  ;;  %v744_v3 = vand.u32 4294901760, %v743_v23  ;;  %v209_v39 = vmax.f32 %v207_v15, %v208_v56  ;;  %v2542_v29 = vand.u32 4294901760, %v287_v14 }
  0x54   : > { %672 = vmatpush.msrb.mxu2 %v2409_v43  ;;  %v216_v22 = vmax.f32 %v214_v20, %v215_v21  ;;  %v750_v23 = vand.u32 4294901760, %v749_v59  ;;  %739 = vmatpush.msrb.mxu3 %v738_v13  ;;  %v3369_v15 = vmov 0  ;;  %v3372_v16 = vand.u32 4294901760, %v2301_v47 }
  0x55   : > { %584 = vmatpush.msrb.mxu0 %v3366_v4  ;;  %631 = vmatpush.msrb.mxu1 %v2223_v5  ;;  %v3367_v5 = vand.u32 4294901760, %v2290_v41  ;;  %v3368_v4 = vand.u32 4294901760, %v2497_v7  ;;  %v3370_v15 = vsel %vm2552_vm2, 4294967295, %v3369_v15  ;;  %v2557_v41 = vsub.f32 %v289_v24, %v2529_v34 }
  0x56   : > { %674 = vmatpush.msrb.mxu2 %v2421_v52  ;;  %v223_v45 = vrot.slane %v216_v22, 7  ;;  %3371 = vst [vmem:[#allocation19_spill] sm:$0xff] %v3370_v15  ;;  %v756_v20 = vand.u32 4294901760, %v755_v37  ;;  %745 = vmatpush.msrb.mxu3 %v744_v3  ;;  %v3373_v59 = vand.u32 4294901760, %v2513_v12  ;;  %v778_v56 = vand.u32 4294901760, %v2540_v60 }
  0x57   : > { %588 = vmatpush.msrb.mxu0 %v3367_v5  ;;  %633 = vmatpush.msrb.mxu1 %v2225_v9  ;;  %v761_v48 = vsub.f32 %v2497_v7, %v3368_v4  ;;  %v2559_v9 = vand.u32 4294901760, %v285_v32  ;;  %v2571_v13 = vsub.f32 %v287_v14, %v2542_v29  ;;  %v3374_v47 = vand.u32 4294901760, %v2313_v53 }
  0x58   : > { %676 = vmatpush.msrb.mxu2 %v2431_v62  ;;  %v767_v22 = vsub.f32 %v2513_v12, %v3373_v59  ;;  %v225_v24 = vsel %vm224_vm1, %v209_v39, %v223_v45  ;;  %751 = vmatpush.msrb.mxu3 %v750_v23  ;;  %v773_v21 = vsub.f32 %v2526_v35, %v772_v8  ;;  %v784_v19 = vand.u32 4294901760, %v2557_v41 }
  0x59   : > { %592 = vmatpush.msrb.mxu0 %v3372_v16  ;;  %635 = vmatpush.msrb.mxu1 %v2227_v10  ;;  %231 = vst.msk [vmem:[#allocation2] sm:$0x3] %vm2552_vm2, %v225_v24  ;;  %v762_v10 = vand.u32 4294901760, %v761_v48  ;;  %v2584_v14 = vsub.f32 %v285_v32, %v2559_v9  ;;  %v3375_v53 = vand.u32 4294901760, %v2318_v54  ;;  %v779_v48 = vsub.f32 %v2540_v60, %v778_v56 }
  0x5a   : > { %678 = vmatpush.msrb.mxu2 %v2443_v26  ;;  %757 = vmatpush.msrb.mxu3 %v756_v20  ;;  %v790_v3 = vand.u32 4294901760, %v2571_v13  ;;  %v3376_v37 = vand.u32 4294901760, %v2337_v6  ;;  %v774_v54 = vand.u32 4294901760, %v773_v21  ;;  %v3377_v39 = vand.u32 4294901760, %v2351_v30 }
  0x5b   : > { %596 = vmatpush.msrb.mxu0 %v3374_v47  ;;  %637 = vmatpush.msrb.mxu1 %v2229_v11  ;;  %v768_v11 = vand.u32 4294901760, %v767_v22  ;;  %v796_v32 = vand.u32 4294901760, %v2584_v14  ;;  %v780_v6 = vand.u32 4294901760, %v779_v48  ;;  %v3378_v23 = vand.u32 4294901760, %v2365_v40  ;;  %v3389_v48 = vld [vmem:[#allocation16_spill] sm:$0xff] }
  0x5c   : > { %680 = vmatpush.msrb.mxu2 %v2459_v49  ;;  %763 = vmatpush.msrb.mxu3 %v762_v10  ;;  %v791_v5 = vsub.f32 %v2571_v13, %v790_v3  ;;  %v3379_v16 = vand.u32 4294901760, %v2373_v44  ;;  %v3382_v59 = vand.u32 4294901760, %v2388_v57  ;;  %v3385_v10 = vld [vmem:[#allocation15_spill] sm:$0xff] }
  0x5d   : > { %600 = vmatpush.msrb.mxu0 %v3375_v53  ;;  %639 = vmatpush.msrb.mxu1 %v2242_v17  ;;  %v785_v17 = vsub.f32 %v2557_v41, %v784_v19  ;;  %v797_v30 = vsub.f32 %v2584_v14, %v796_v32  ;;  %v3387_v53 = vld [vmem:[#allocation12_spill] sm:$0xff] }
  0x5e   : > { %682 = vmatpush.msrb.mxu2 %v2473_v61  ;;  %769 = vmatpush.msrb.mxu3 %v768_v11  ;;  %v3388_v11 = vld [vmem:[#allocation13_spill] sm:$0xff] }
  0x5f   : > { %604 = vmatpush.msrb.mxu0 %v3376_v37  ;;  %641 = vmatpush.msrb.mxu1 %v2258_v25  ;;  %v3390_v37 = vand.u32 4294901760, %v3389_v48 }
  0x60   : > { %684 = vmatpush.msrb.mxu2 %v2487_v18  ;;  %v252_v25 = vld [vmem:[#allocation2] sm:$0x3]  ;;  %775 = vmatpush.msrb.mxu3 %v774_v54  ;;  %v3392_v54 = vld [vmem:[#allocation14_spill] sm:$0xff] }
  0x61   : > { %608 = vmatpush.msrb.mxu0 %v3377_v39  ;;  %643 = vmatpush.msrb.mxu1 %v2262_v28  ;;  %v318_v4 = vperm.slane %v252_v25, 0  ;;  %v319_v45 = vperm.slane %v252_v25, 1  ;;  %v786_v28 = vand.u32 4294901760, %v785_v17  ;;  %v3393_v17 = vld [vmem:[#allocation17_spill] sm:$0xff] }
  0x62   : > { %686 = vmatpush.msrb.mxu2 %v2499_v46  ;;  %781 = vmatpush.msrb.mxu3 %v780_v6  ;;  %v3394_v39 = vand.u32 4294901760, %v3393_v17  ;;  %v3395_v6 = vld [vmem:[#allocation18_spill] sm:$0xff] }
  0x63   : > { %612 = vmatpush.msrb.mxu0 %v3378_v23  ;;  %645 = vmatpush.msrb.mxu1 %v2281_v36  ;;  %v2619_v20 = vand.u32 4294901760, %v318_v4  ;;  %v2621_v40 = vand.u32 4294901760, %v319_v45  ;;  %v792_v36 = vand.u32 4294901760, %v791_v5  ;;  %v3396_v25 = vand.u32 4294901760, %v3395_v6  ;;  %v272_v23 = vld [vmem:[#allocation3 + $0x98] sm:$0xff] }
  0x64   : > { %688 = vmatpush.msrb.mxu2 %v2516_v0  ;;  %787 = vmatpush.msrb.mxu3 %v786_v28  ;;  %v3397_v5 = vand.u32 4294901760, %v2439_v27 }
  0x65   : > { %616 = vmatpush.msrb.mxu0 %v3379_v16  ;;  %647 = vmatpush.msrb.mxu1 %v2293_v42  ;;  %3380 = vst [vmem:[#allocation20_spill] sm:$0xff] %v2619_v20  ;;  %v2628_v22 = vsub.f32 %v318_v4, %v2619_v20  ;;  %v2631_v44 = vsub.f32 %v319_v45, %v2621_v40  ;;  %v798_v42 = vand.u32 4294901760, %v797_v30  ;;  %v270_v4 = vld [vmem:[#allocation3 + $0x88] sm:$0xff] }
  0x66   : > { %3381 = vst [vmem:[#allocation21_spill] sm:$0xff] %v2621_v40  ;;  %690 = vmatpush.msrb.mxu2 %v2529_v34  ;;  %793 = vmatpush.msrb.mxu3 %v792_v36  ;;  %v266_v36 = vld [vmem:[#allocation3 + $0x68] sm:$0xff] }
  0x67   : > { %620 = vmatpush.msrb.mxu0 %v3382_v59  ;;  %649 = vmatpush.msrb.mxu1 %v2309_v51  ;;  %3383 = vst [vmem:[#allocation22_spill] sm:$0xff] %v2631_v44  ;;  %v2635_v24 = vand.u32 4294901760, %v2628_v22  ;;  %v2640_v57 = vand.u32 4294901760, %v2631_v44 }
  0x68   : > { %692 = vmatpush.msrb.mxu2 %v2542_v29  ;;  %799 = vmatpush.msrb.mxu3 %v798_v42 }
  0x69   : > { %651 = vmatpush.msrb.mxu1 %v2324_v58  ;;  %514 = vmatmul.f32.vlgmr.msra.gmra.mxu2 %v2628_v22  ;;  %3384 = vst [vmem:[#allocation23_spill] sm:$0xff] %v2640_v57  ;;  %v357_v51 = vsub.f32 %v2628_v22, %v2635_v24  ;;  %v698_v47 = vsub.f32 %v2631_v44, %v2640_v57  ;;  %v3386_v58 = vand.u32 4294901760, %v3385_v10 }
  0x6a   : > { %694 = vmatpush.msrb.mxu2 %v2559_v9  ;;  %553 = vmatmul.f32.vlgmr.msra.gmra.mxu3 %v2635_v24 }
  0x6b   : > { %653 = vmatpush.msrb.mxu1 %v2333_v1  ;;  %v2651_v21 = vand.u32 4294901760, %v357_v51  ;;  %968 = vmatpush.msra.mxu3 %v3388_v11  ;;  %v2658_v1 = vand.u32 4294901760, %v698_v47 }
  0x6c   : > { %901 = vmatpush.msra.mxu2 %v3386_v58  ;;  %460 = vmatmul.f32.vlgmr.msra.gmra.mxu1 %v2619_v20 }
  0x6d   : > { %655 = vmatpush.msrb.mxu1 %v3387_v53  ;;  %3391 = vst [vmem:[#allocation15_spill] sm:$0xff] %v2658_v1  ;;  %359 = vmatmul.f32.vlgmr.msra.gmra.mxu0 %v2651_v21 }
  0x6e   : > { %905 = vmatpush.msra.mxu2 %v3390_v37  ;;  %807 = vmatpush.msra.mxu0 %v3385_v10  ;;  %v264_v10 = vld [vmem:[#allocation3 + $0x58] sm:$0xff] }
  0x6f   : > { %657 = vmatpush.msrb.mxu1 %v3392_v54  ;;  %970 = vmatpush.msra.mxu3 %v2353_v31  ;;  %v262_v54 = vld [vmem:[#allocation3 + $0x48] sm:$0xff] }
  0x70   : > { %909 = vmatpush.msra.mxu2 %v3394_v39  ;;  %810 = vmatpush.msra.mxu0 %v3389_v48  ;;  %v2819_v39 = vand.u32 4294901760, %v264_v10 }
  0x71   : > { %860 = vmatpush.msra.mxu1 %v3388_v11  ;;  %700 = vmatmul.f32.vlgmr.msrb.gmra.mxu2 %v2658_v1  ;;  %v2809_v11 = vand.u32 4294901760, %v266_v36 }
  0x72   : > { %913 = vmatpush.msra.mxu2 %v3396_v25  ;;  %813 = vmatpush.msra.mxu0 %v3393_v17 }
  0x73   : > { %862 = vmatpush.msra.mxu1 %v2353_v31  ;;  %972 = vmatpush.msra.mxu3 %v2380_v55  ;;  %v3398_v31 = vand.u32 4294901760, %v2451_v38 }
  0x74   : > { %801 = vmatmul.f32.vlgmr.msrb.gmra.mxu3 %v2621_v40  ;;  %816 = vmatpush.msra.mxu0 %v3395_v6 }
  0x75   : > { %864 = vmatpush.msra.mxu1 %v2380_v55  ;;  %917 = vmatpush.msra.mxu2 %v3397_v5  ;;  %v3399_v55 = vand.u32 4294901760, %v2457_v50  ;;  %v260_v5 = vld [vmem:[#allocation3 + $0x38] sm:$0xff] }
  0x76   : > { %622 = vmatmul.f32.vlgmr.msrb.gmra.mxu0 %v2619_v20  ;;  %974 = vmatpush.msra.mxu3 %v2395_v63 }
  0x77   : > { %819 = vmatpush.msra.mxu0 %v2439_v27  ;;  %659 = vmatmul.f32.vlgmr.msrb.gmra.mxu1 %v2619_v20  ;;  %v3400_v27 = vand.u32 4294901760, %v2471_v2 }
  0x78   : > { %866 = vmatpush.msra.mxu1 %v2395_v63  ;;  %921 = vmatpush.msra.mxu2 %v3398_v31  ;;  %v3401_v63 = vand.u32 4294901760, %v2485_v33 }
  0x79   : > { %822 = vmatpush.msra.mxu0 %v2451_v38  ;;  %976 = vmatpush.msra.mxu3 %v2409_v43  ;;  %v284_v38 = vld [vmem:[#allocation3 + $0xf8] sm:$0xff] }
  0x7a   : > { %868 = vmatpush.msra.mxu1 %v2409_v43  ;;  %925 = vmatpush.msra.mxu2 %v3399_v55  ;;  %v282_v43 = vld [vmem:[#allocation3 + $0xe8] sm:$0xff] }
  0x7b   : > { %825 = vmatpush.msra.mxu0 %v2457_v50  ;;  %978 = vmatpush.msra.mxu3 %v2421_v52  ;;  %v2708_v50 = vand.u32 4294901760, %v284_v38 }
  0x7c   : > { %870 = vmatpush.msra.mxu1 %v2421_v52  ;;  %929 = vmatpush.msra.mxu2 %v3400_v27  ;;  %v3402_v52 = vand.u32 4294901760, %v2497_v7  ;;  %v2831_v27 = vand.u32 4294901760, %v262_v54 }
  0x7d   : > { %828 = vmatpush.msra.mxu0 %v2471_v2  ;;  %980 = vmatpush.msra.mxu3 %v2431_v62  ;;  %v280_v2 = vld [vmem:[#allocation3 + $0xd8] sm:$0xff] }
  0x7e   : > { %872 = vmatpush.msra.mxu1 %v2431_v62  ;;  %933 = vmatpush.msra.mxu2 %v3401_v63  ;;  %v3403_v62 = vand.u32 4294901760, %v2513_v12  ;;  %v2834_v63 = vsub.f32 %v266_v36, %v2809_v11  ;;  %v316_v36 = vld [vmem:[#allocation3 + $0x1f8] sm:$0xff] }
  0x7f   : > { %831 = vmatpush.msra.mxu0 %v2485_v33  ;;  %982 = vmatpush.msra.mxu3 %v2443_v26  ;;  %v278_v33 = vld [vmem:[#allocation3 + $0xc8] sm:$0xff] }
  0x80   : > { %874 = vmatpush.msra.mxu1 %v2443_v26  ;;  %937 = vmatpush.msra.mxu2 %v3402_v52  ;;  %v2715_v26 = vand.u32 4294901760, %v282_v43  ;;  %v258_v52 = vld [vmem:[#allocation3 + $0x28] sm:$0xff] }
  0x81   : > { %834 = vmatpush.msra.mxu0 %v2497_v7  ;;  %984 = vmatpush.msra.mxu3 %v2459_v49  ;;  %v2725_v7 = vsub.f32 %v284_v38, %v2708_v50 }
  0x82   : > { %876 = vmatpush.msra.mxu1 %v2459_v49  ;;  %941 = vmatpush.msra.mxu2 %v3403_v62  ;;  %v2722_v49 = vand.u32 4294901760, %v280_v2  ;;  %v2842_v62 = vand.u32 4294901760, %v260_v5 }
  0x83   : > { %837 = vmatpush.msra.mxu0 %v2513_v12  ;;  %986 = vmatpush.msra.mxu3 %v2473_v61  ;;  %v276_v12 = vld [vmem:[#allocation3 + $0xb8] sm:$0xff] }
  0x84   : > { %878 = vmatpush.msra.mxu1 %v2473_v61  ;;  %945 = vmatpush.msra.mxu2 %v772_v8  ;;  %v2732_v61 = vand.u32 4294901760, %v278_v33  ;;  %v2735_v8 = vsub.f32 %v282_v43, %v2715_v26 }
  0x85   : > { %840 = vmatpush.msra.mxu0 %v2526_v35  ;;  %988 = vmatpush.msra.mxu3 %v2487_v18  ;;  %v274_v35 = vld [vmem:[#allocation3 + $0xa8] sm:$0xff] }
  0x86   : > { %880 = vmatpush.msra.mxu1 %v2487_v18  ;;  %949 = vmatpush.msra.mxu2 %v778_v56  ;;  %v2742_v18 = vand.u32 4294901760, %v276_v12  ;;  %v2746_v56 = vsub.f32 %v280_v2, %v2722_v49 }
  0x87   : > { %843 = vmatpush.msra.mxu0 %v2540_v60  ;;  %990 = vmatpush.msra.mxu3 %v2499_v46  ;;  %v3327_v60 = vand.u32 4294901760, %v2725_v7 }
  0x88   : > { %882 = vmatpush.msra.mxu1 %v2499_v46  ;;  %953 = vmatpush.msra.mxu2 %v784_v19  ;;  %v2753_v46 = vand.u32 4294901760, %v274_v35  ;;  %v2757_v19 = vsub.f32 %v278_v33, %v2732_v61  ;;  %v2771_v45 = vsub.f32 %v276_v12, %v2742_v18  ;;  %v2846_v33 = vsub.f32 %v264_v10, %v2819_v39 }
  0x89   : > { %846 = vmatpush.msra.mxu0 %v2557_v41  ;;  %992 = vmatpush.msra.mxu3 %v2516_v0  ;;  %v3325_v41 = vand.u32 4294901760, %v2735_v8 }
  0x8a   : > { %884 = vmatpush.msra.mxu1 %v2516_v0  ;;  %957 = vmatpush.msra.mxu2 %v790_v3  ;;  %v2762_v0 = vand.u32 4294901760, %v272_v23  ;;  %v3324_v3 = vand.u32 4294901760, %v2746_v56  ;;  %v3323_v28 = vand.u32 4294901760, %v2757_v19  ;;  %v2784_v30 = vsub.f32 %v274_v35, %v2753_v46  ;;  %v256_v35 = vld [vmem:[#allocation3 + $0x18] sm:$0xff] }
  0x8b   : > { %849 = vmatpush.msra.mxu0 %v2571_v13  ;;  %994 = vmatpush.msra.mxu3 %v2529_v34  ;;  %v1048_v13 = vsub.f32 %v2725_v7, %v3327_v60  ;;  %v3321_v47 = vand.u32 4294901760, %v2771_v45  ;;  %v3317_v10 = vand.u32 4294901760, %v2846_v33  ;;  %v304_v60 = vld [vmem:[#allocation3 + $0x198] sm:$0xff] }
  0x8c   : > { %886 = vmatpush.msra.mxu1 %v2529_v34  ;;  %961 = vmatpush.msra.mxu2 %v796_v32  ;;  %v2775_v34 = vand.u32 4294901760, %v270_v4  ;;  %v268_v32 = vld [vmem:[#allocation3 + $0x78] sm:$0xff]  ;;  %v2789_v16 = vsub.f32 %v272_v23, %v2762_v0  ;;  %v1060_v42 = vsub.f32 %v2746_v56, %v3324_v3  ;;  %v1066_v53 = vsub.f32 %v2757_v19, %v3323_v28  ;;  %v306_v3 = vld [vmem:[#allocation3 + $0x1a8] sm:$0xff] }
  0x8d   : > { %852 = vmatpush.msra.mxu0 %v2584_v14  ;;  %996 = vmatpush.msra.mxu3 %v2542_v29  ;;  %v1054_v14 = vsub.f32 %v2735_v8, %v3325_v41  ;;  %v1049_v59 = vand.u32 4294901760, %v1048_v13  ;;  %v2796_v51 = vand.u32 4294901760, %v268_v32  ;;  %v3319_v48 = vand.u32 4294901760, %v2784_v30 }
  0x8e   : > { %855 = vmatmul.f32.vlgmr.msra.gmra.mxu0 %v2631_v44  ;;  %963 = vmatmul.f32.vlgmr.msra.gmra.mxu2 %v2621_v40  ;;  %v3318_v37 = vand.u32 4294901760, %v2789_v16  ;;  %v1072_v17 = vsub.f32 %v2771_v45, %v3321_v47  ;;  %v1067_v31 = vand.u32 4294901760, %v1066_v53  ;;  %v3314_v13 = vand.u32 4294901760, %v2834_v63  ;;  %v254_v53 = vld [vmem:[#allocation3 + $0x8] sm:$0xff] }
  0x8f   : > { %1005 = vmatpush.msrb.mxu0 %v2708_v50  ;;  %1148 = vmatpush.msrb.mxu2 %v2725_v7  ;;  %v1055_v58 = vand.u32 4294901760, %v1054_v14  ;;  %v2822_v6 = vsub.f32 %v268_v32, %v2796_v51  ;;  %v1078_v55 = vsub.f32 %v2784_v30, %v3319_v48  ;;  %v2858_v32 = vsub.f32 %v262_v54, %v2831_v27 }
  0x90   : > { %888 = vmatpush.msra.mxu1 %v2542_v29  ;;  %998 = vmatpush.msra.mxu3 %v2559_v9  ;;  %v2802_v29 = vsub.f32 %v270_v4, %v2775_v34  ;;  %v1084_v38 = vsub.f32 %v2789_v16, %v3318_v37  ;;  %v1073_v43 = vand.u32 4294901760, %v1072_v17  ;;  %v2854_v4 = vand.u32 4294901760, %v258_v52 }
  0x91   : > { %1007 = vmatpush.msrb.mxu0 %v2715_v26  ;;  %1000 = vmatmul.f32.vlgmr.msra.gmra.mxu3 %v2621_v40  ;;  %v3315_v2 = vand.u32 4294901760, %v2822_v6  ;;  %v1079_v23 = vand.u32 4294901760, %v1078_v55  ;;  %v3320_v17 = vand.u32 4294901760, %v2858_v32  ;;  %v314_v55 = vld [vmem:[#allocation3 + $0x1e8] sm:$0xff]  ;;  %v3408_v44 = vand.u32 4294901760, %v2725_v7 }
  0x92   : > { %1151 = vmatpush.msrb.mxu2 %v2735_v8  ;;  %1201 = vmatpush.msrb.mxu3 %v2708_v50  ;;  %v3316_v25 = vand.u32 4294901760, %v2802_v29  ;;  %v1085_v14 = vand.u32 4294901760, %v1084_v38  ;;  %v2886_v38 = vand.u32 4294901760, %v254_v53 }
  0x93   : > { %1009 = vmatpush.msrb.mxu0 %v2722_v49  ;;  %890 = vmatpush.msra.mxu1 %v2559_v9  ;;  %v1061_v9 = vand.u32 4294901760, %v1060_v42  ;;  %v2866_v42 = vand.u32 4294901760, %v256_v35 }
  0x94   : > { %894 = vmatmul.f32.vlgmr.msra.gmra.mxu1 %v2640_v57  ;;  %1154 = vmatpush.msrb.mxu2 %v2746_v56  ;;  %v1090_v12 = vsub.f32 %v2802_v29, %v3316_v25  ;;  %v310_v25 = vld [vmem:[#allocation3 + $0x1c8] sm:$0xff]  ;;  %v2911_v37 = vsub.f32 %v254_v53, %v2886_v38 }
  0x95   : > { %1011 = vmatpush.msrb.mxu0 %v2732_v61  ;;  %1050 = vmatpush.msrb.mxu1 %v1049_v59  ;;  %v1096_v59 = vsub.f32 %v2822_v6, %v3315_v2  ;;  %3404 = vst [vmem:[#allocation12_spill] sm:$0xff] %v2866_v42  ;;  %v2898_v2 = vand.u32 4294901760, %v314_v55  ;;  %v2920_v47 = vand.u32 4294901760, %v310_v25 }
  0x96   : > { %1203 = vmatpush.msrb.mxu3 %v2715_v26  ;;  %1157 = vmatpush.msrb.mxu2 %v2757_v19  ;;  %v1091_v54 = vand.u32 4294901760, %v1090_v12  ;;  %v1108_v12 = vsub.f32 %v2846_v33, %v3317_v10 }
  0x97   : > { %1013 = vmatpush.msrb.mxu0 %v2742_v18  ;;  %1056 = vmatpush.msrb.mxu1 %v1055_v58  ;;  %v2870_v58 = vsub.f32 %v260_v5, %v2842_v62  ;;  %v2882_v5 = vand.u32 4294901760, %v316_v36  ;;  %3406 = vst [vmem:[#allocation16_spill] sm:$0xff] %v2898_v2  ;;  %v2925_v53 = vsub.f32 %v314_v55, %v2898_v2  ;;  %v3407_v55 = vand.u32 4294901760, %v2911_v37 }
  0x98   : > { %1205 = vmatpush.msrb.mxu3 %v2722_v49  ;;  %1160 = vmatpush.msrb.mxu2 %v2771_v45 }
  0x99   : > { %1015 = vmatpush.msrb.mxu0 %v2753_v46  ;;  %1062 = vmatpush.msrb.mxu1 %v1061_v9  ;;  %v1102_v9 = vsub.f32 %v2834_v63, %v3314_v13  ;;  %3405 = vst [vmem:[#allocation13_spill] sm:$0xff] %v2882_v5  ;;  %v312_v13 = vld [vmem:[#allocation3 + $0x1d8] sm:$0xff]  ;;  %v1138_v15 = vsub.f32 %v2911_v37, %v3407_v55  ;;  %v3409_v40 = vand.u32 4294901760, %v2925_v53 }
  0x9a   : > { %1207 = vmatpush.msrb.mxu3 %v2732_v61  ;;  %1163 = vmatpush.msrb.mxu2 %v2784_v30  ;;  %v2913_v48 = vand.u32 4294901760, %v312_v13 }
  0x9b   : > { %1017 = vmatpush.msrb.mxu0 %v2762_v0  ;;  %1068 = vmatpush.msrb.mxu1 %v1067_v31  ;;  %v2880_v31 = vsub.f32 %v258_v52, %v2854_v4  ;;  %v3322_v52 = vand.u32 4294901760, %v2870_v58  ;;  %v1395_v55 = vsub.f32 %v2925_v53, %v3409_v40  ;;  %v1139_v7 = vand.u32 4294901760, %v1138_v15 }
  0x9c   : > { %1209 = vmatpush.msrb.mxu3 %v2742_v18  ;;  %1166 = vmatpush.msrb.mxu2 %v2789_v16  ;;  %v2938_v41 = vsub.f32 %v312_v13, %v2913_v48  ;;  %v2950_v13 = vand.u32 4294901760, %v306_v3 }
  0x9d   : > { %1019 = vmatpush.msrb.mxu0 %v2775_v34  ;;  %1074 = vmatpush.msrb.mxu1 %v1073_v43  ;;  %v1097_v43 = vand.u32 4294901760, %v1096_v59  ;;  %v1114_v59 = vsub.f32 %v2858_v32, %v3320_v17  ;;  %v3326_v10 = vand.u32 4294901760, %v2880_v31  ;;  %v1120_v17 = vsub.f32 %v2870_v58, %v3322_v52 }
  0x9e   : > { %1211 = vmatpush.msrb.mxu3 %v2753_v46  ;;  %1169 = vmatpush.msrb.mxu2 %v2802_v29  ;;  %v2976_v57 = vsub.f32 %v306_v3, %v2950_v13  ;;  %v3411_v40 = vand.u32 4294901760, %v2938_v41  ;;  %v1396_v15 = vand.u32 4294901760, %v1395_v55 }
  0x9f   : > { %1021 = vmatpush.msrb.mxu0 %v2796_v51  ;;  %1080 = vmatpush.msrb.mxu1 %v1079_v23  ;;  %v2894_v23 = vsub.f32 %v256_v35, %v2866_v42  ;;  %v2906_v35 = vsub.f32 %v316_v36, %v2882_v5 }
  0xa0   : > { %1213 = vmatpush.msrb.mxu3 %v2762_v0  ;;  %1172 = vmatpush.msrb.mxu2 %v2822_v6  ;;  %v1401_v3 = vsub.f32 %v2938_v41, %v3411_v40 }
  0xa1   : > { %1023 = vmatpush.msrb.mxu0 %v2809_v11  ;;  %1086 = vmatpush.msrb.mxu1 %v1085_v14  ;;  %v1103_v14 = vand.u32 4294901760, %v1102_v9  ;;  %v1109_v9 = vand.u32 4294901760, %v1108_v12  ;;  %v3328_v36 = vand.u32 4294901760, %v2894_v23  ;;  %v1126_v12 = vsub.f32 %v2880_v31, %v3326_v10 }
  0xa2   : > { %1215 = vmatpush.msrb.mxu3 %v2775_v34  ;;  %1175 = vmatpush.msrb.mxu2 %v2834_v63  ;;  %v3331_v52 = vand.u32 4294901760, %v2906_v35  ;;  %v2945_v10 = vsub.f32 %v310_v25, %v2920_v47  ;;  %v1402_v55 = vand.u32 4294901760, %v1401_v3 }
  0xa3   : > { %1025 = vmatpush.msrb.mxu0 %v2819_v39  ;;  %1092 = vmatpush.msrb.mxu1 %v1091_v54  ;;  %v308_v54 = vld [vmem:[#allocation3 + $0x1b8] sm:$0xff] }
  0xa4   : > { %1217 = vmatpush.msrb.mxu3 %v2796_v51  ;;  %1178 = vmatpush.msrb.mxu2 %v2846_v33  ;;  %v2932_v28 = vand.u32 4294901760, %v308_v54 }
  0xa5   : > { %1027 = vmatpush.msrb.mxu0 %v2831_v27  ;;  %1098 = vmatpush.msrb.mxu1 %v1097_v43  ;;  %v1115_v43 = vand.u32 4294901760, %v1114_v59  ;;  %v1132_v59 = vsub.f32 %v2894_v23, %v3328_v36  ;;  %v302_v36 = vld [vmem:[#allocation3 + $0x188] sm:$0xff] }
  0xa6   : > { %1219 = vmatpush.msrb.mxu3 %v2809_v11  ;;  %1181 = vmatpush.msrb.mxu2 %v2858_v32  ;;  %v2957_v25 = vsub.f32 %v308_v54, %v2932_v28  ;;  %v2978_v1 = vand.u32 4294901760, %v302_v36  ;;  %v298_v54 = vld [vmem:[#allocation3 + $0x168] sm:$0xff] }
  0xa7   : > { %1029 = vmatpush.msrb.mxu0 %v2842_v62  ;;  %1104 = vmatpush.msrb.mxu1 %v1103_v14  ;;  %v1121_v14 = vand.u32 4294901760, %v1120_v17  ;;  %v1127_v17 = vand.u32 4294901760, %v1126_v12  ;;  %v1133_v12 = vand.u32 4294901760, %v1132_v59  ;;  %v3413_v59 = vand.u32 4294901760, %v2746_v56 }
  0xa8   : > { %1221 = vmatpush.msrb.mxu3 %v2819_v39  ;;  %1184 = vmatpush.msrb.mxu2 %v2870_v58  ;;  %v3415_v56 = vand.u32 4294901760, %v2757_v19  ;;  %v3417_v19 = vand.u32 4294901760, %v2976_v57 }
  0xa9   : > { %1031 = vmatpush.msrb.mxu0 %v2854_v4  ;;  %1110 = vmatpush.msrb.mxu1 %v1109_v9  ;;  %v1389_v9 = vsub.f32 %v2906_v35, %v3331_v52  ;;  %v300_v52 = vld [vmem:[#allocation3 + $0x178] sm:$0xff] }
  0xaa   : > { %1223 = vmatpush.msrb.mxu3 %v2831_v27  ;;  %1187 = vmatpush.msrb.mxu2 %v2880_v31 }
  0xab   : > { %1033 = vmatpush.msrb.mxu0 %v2866_v42  ;;  %1116 = vmatpush.msrb.mxu1 %v1115_v43  ;;  %v2965_v43 = vand.u32 4294901760, %v304_v60 }
  0xac   : > { %1225 = vmatpush.msrb.mxu3 %v2842_v62  ;;  %1190 = vmatpush.msrb.mxu2 %v2894_v23 }
  0xad   : > { %1035 = vmatpush.msrb.mxu0 %v2886_v38  ;;  %1122 = vmatpush.msrb.mxu1 %v1121_v14  ;;  %v1390_v14 = vand.u32 4294901760, %v1389_v9  ;;  %v2989_v20 = vsub.f32 %v304_v60, %v2965_v43  ;;  %v3412_v9 = vand.u32 4294901760, %v2945_v10  ;;  %v3002_v60 = vsub.f32 %v302_v36, %v2978_v1 }
  0xae   : > { %1227 = vmatpush.msrb.mxu3 %v2854_v4  ;;  %1193 = vmatpush.msrb.mxu2 %v2911_v37 }
  0xaf   : > { %1242 = vmatpush.msra.mxu0 %v3408_v44  ;;  %1128 = vmatpush.msrb.mxu1 %v1127_v17  ;;  %v3410_v44 = vand.u32 4294901760, %v2735_v8  ;;  %v2991_v17 = vand.u32 4294901760, %v300_v52  ;;  %v1407_v8 = vsub.f32 %v2945_v10, %v3412_v9  ;;  %v3343_v3 = vand.u32 4294901760, %v3002_v60 }
  0xb0   : > { %1229 = vmatpush.msrb.mxu3 %v2866_v42  ;;  %1346 = vmatpush.msra.mxu2 %v2882_v5  ;;  %v3004_v42 = vand.u32 4294901760, %v298_v54  ;;  %v294_v5 = vld [vmem:[#allocation3 + $0x148] sm:$0xff] }
  0xb1   : > { %1246 = vmatpush.msra.mxu0 %v3410_v44  ;;  %1134 = vmatpush.msrb.mxu1 %v1133_v12  ;;  %v296_v44 = vld [vmem:[#allocation3 + $0x158] sm:$0xff]  ;;  %v3414_v12 = vand.u32 4294901760, %v2957_v25  ;;  %v3014_v36 = vsub.f32 %v300_v52, %v2991_v17 }
  0xb2   : > { %1231 = vmatpush.msrb.mxu3 %v2886_v38  ;;  %1348 = vmatpush.msra.mxu2 %v2898_v2  ;;  %v3016_v40 = vand.u32 4294901760, %v296_v44  ;;  %v292_v2 = vld [vmem:[#allocation3 + $0x138] sm:$0xff]  ;;  %v3027_v52 = vsub.f32 %v298_v54, %v3004_v42 }
  0xb3   : > { %1250 = vmatpush.msra.mxu0 %v3413_v59  ;;  %v1413_v9 = vsub.f32 %v2957_v25, %v3414_v12  ;;  %1140 = vmatpush.msrb.mxu1 %v1139_v7  ;;  %v1424_v59 = vand.u32 4294901760, %v2989_v20  ;;  %v3416_v12 = vand.u32 4294901760, %v2771_v45  ;;  %v1419_v7 = vsub.f32 %v2976_v57, %v3417_v19  ;;  %v290_v19 = vld [vmem:[#allocation3 + $0x128] sm:$0xff] }
  0xb4   : > { %1391 = vmatpush.msra.mxu3 %v1390_v14  ;;  %1350 = vmatpush.msra.mxu2 %v2913_v48  ;;  %v1408_v14 = vand.u32 4294901760, %v1407_v8  ;;  %v3418_v45 = vand.u32 4294901760, %v2784_v30  ;;  %v3040_v54 = vsub.f32 %v296_v44, %v3016_v40 }
  0xb5   : > { %1254 = vmatpush.msra.mxu0 %v3415_v56  ;;  %1309 = vmatpush.msra.mxu1 %v2708_v50  ;;  %v3029_v56 = vand.u32 4294901760, %v294_v5  ;;  %v1414_v50 = vand.u32 4294901760, %v1413_v9  ;;  %v1425_v8 = vsub.f32 %v2989_v20, %v1424_v59  ;;  %v1420_v30 = vand.u32 4294901760, %v1419_v7 }
  0xb6   : > { %1397 = vmatpush.msra.mxu3 %v1396_v15  ;;  %1352 = vmatpush.msra.mxu2 %v2920_v47  ;;  %v1436_v15 = vand.u32 4294901760, %v3014_v36  ;;  %v1431_v9 = vsub.f32 %v3002_v60, %v3343_v3  ;;  %v286_v3 = vld [vmem:[#allocation3 + $0x108] sm:$0xff] }
  0xb7   : > { %1258 = vmatpush.msra.mxu0 %v3416_v12  ;;  %1311 = vmatpush.msra.mxu1 %v2715_v26  ;;  %v3042_v12 = vand.u32 4294901760, %v292_v2  ;;  %v3419_v26 = vand.u32 4294901760, %v2789_v16  ;;  %v3053_v44 = vsub.f32 %v294_v5, %v3029_v56  ;;  %v3420_v16 = vand.u32 4294901760, %v2802_v29 }
  0xb8   : > { %1403 = vmatpush.msra.mxu3 %v1402_v55  ;;  %1354 = vmatpush.msra.mxu2 %v2932_v28  ;;  %v1442_v55 = vand.u32 4294901760, %v3027_v52  ;;  %v1437_v7 = vsub.f32 %v3014_v36, %v1436_v15  ;;  %v3421_v29 = vand.u32 4294901760, %v2822_v6 }
  0xb9   : > { %1262 = vmatpush.msra.mxu0 %v3418_v45  ;;  %1313 = vmatpush.msra.mxu1 %v2722_v49  ;;  %v288_v45 = vld [vmem:[#allocation3 + $0x118] sm:$0xff]  ;;  %v3057_v49 = vand.u32 4294901760, %v290_v19  ;;  %v3066_v5 = vsub.f32 %v292_v2, %v3042_v12  ;;  %v3422_v2 = vand.u32 4294901760, %v2834_v63  ;;  %v3423_v63 = vand.u32 4294901760, %v2846_v33 }
  0xba   : > { %1409 = vmatpush.msra.mxu3 %v1408_v14  ;;  %1356 = vmatpush.msra.mxu2 %v2950_v13  ;;  %v1426_v14 = vand.u32 4294901760, %v1425_v8  ;;  %v1443_v8 = vsub.f32 %v3027_v52, %v1442_v55  ;;  %v1438_v6 = vand.u32 4294901760, %v1437_v7  ;;  %v3424_v7 = vand.u32 4294901760, %v2858_v32 }
  0xbb   : > { %1266 = vmatpush.msra.mxu0 %v3419_v26  ;;  %1315 = vmatpush.msra.mxu1 %v2732_v61  ;;  %v1448_v26 = vand.u32 4294901760, %v3040_v54  ;;  %v3070_v61 = vand.u32 4294901760, %v288_v45 }
  0xbc   : > { %1415 = vmatpush.msra.mxu3 %v1414_v50  ;;  %1358 = vmatpush.msra.mxu2 %v2965_v43  ;;  %v1432_v50 = vand.u32 4294901760, %v1431_v9  ;;  %v1460_v9 = vand.u32 4294901760, %v3066_v5 }
  0xbd   : > { %1270 = vmatpush.msra.mxu0 %v3420_v16  ;;  %1317 = vmatpush.msra.mxu1 %v2742_v18  ;;  %v1454_v16 = vand.u32 4294901760, %v3053_v44  ;;  %v3081_v18 = vsub.f32 %v290_v19, %v3057_v49  ;;  %v1444_v19 = vand.u32 4294901760, %v1443_v8  ;;  %v3425_v8 = vand.u32 4294901760, %v2870_v58 }
  0xbe   : > { %1421 = vmatpush.msra.mxu3 %v1420_v30  ;;  %1360 = vmatpush.msra.mxu2 %v2978_v1  ;;  %v1449_v30 = vsub.f32 %v3040_v54, %v1448_v26  ;;  %v1461_v33 = vsub.f32 %v3066_v5, %v1460_v9  ;;  %v3427_v58 = vand.u32 4294901760, %v2894_v23 }
  0xbf   : > { %1274 = vmatpush.msra.mxu0 %v3421_v29  ;;  %1319 = vmatpush.msra.mxu1 %v2753_v46  ;;  %v3089_v29 = vand.u32 4294901760, %v286_v3  ;;  %v3094_v46 = vsub.f32 %v288_v45, %v3070_v61 }
  0xc0   : > { %1427 = vmatpush.msra.mxu3 %v1426_v14  ;;  %1362 = vmatpush.msra.mxu2 %v2991_v17  ;;  %v1455_v14 = vsub.f32 %v3053_v44, %v1454_v16  ;;  %v1450_v45 = vand.u32 4294901760, %v1449_v30  ;;  %v3428_v30 = vand.u32 4294901760, %v2911_v37 }
  0xc1   : > { %1278 = vmatpush.msra.mxu0 %v3422_v2  ;;  %1321 = vmatpush.msra.mxu1 %v2762_v0  ;;  %v1466_v0 = vand.u32 4294901760, %v3081_v18  ;;  %v3426_v2 = vand.u32 4294901760, %v2880_v31 }
  0xc2   : > { %1433 = vmatpush.msra.mxu3 %v1432_v50  ;;  %1364 = vmatpush.msra.mxu2 %v3004_v42  ;;  %v3110_v50 = vsub.f32 %v286_v3, %v3089_v29  ;;  %v1456_v32 = vand.u32 4294901760, %v1455_v14 }
  0xc3   : > { %1282 = vmatpush.msra.mxu0 %v3423_v63  ;;  %1323 = vmatpush.msra.mxu1 %v2775_v34  ;;  %v1472_v34 = vand.u32 4294901760, %v3094_v46  ;;  %v1467_v3 = vsub.f32 %v3081_v18, %v1466_v0  ;;  %v3436_v63 = vld [vmem:[#allocation15_spill] sm:$0xff] }
  0xc4   : > { %1439 = vmatpush.msra.mxu3 %v1438_v6  ;;  %1366 = vmatpush.msra.mxu2 %v3016_v40  ;;  %v1478_v6 = vand.u32 4294901760, %v3110_v50 }
  0xc5   : > { %1286 = vmatpush.msra.mxu0 %v3424_v7  ;;  %1325 = vmatpush.msra.mxu1 %v2796_v51  ;;  %v1462_v51 = vand.u32 4294901760, %v1461_v33  ;;  %v1468_v31 = vand.u32 4294901760, %v1467_v3 }
  0xc6   : > { %1445 = vmatpush.msra.mxu3 %v1444_v19  ;;  %1368 = vmatpush.msra.mxu2 %v3029_v56 }
  0xc7   : > { %1290 = vmatpush.msra.mxu0 %v3425_v8  ;;  %1327 = vmatpush.msra.mxu1 %v2809_v11  ;;  %v1473_v11 = vsub.f32 %v3094_v46, %v1472_v34 }
  0xc8   : > { %1451 = vmatpush.msra.mxu3 %v1450_v45  ;;  %1370 = vmatpush.msra.mxu2 %v3042_v12 }
  0xc9   : > { %1294 = vmatpush.msra.mxu0 %v3426_v2  ;;  %1329 = vmatpush.msra.mxu1 %v2819_v39  ;;  %v1479_v39 = vsub.f32 %v3110_v50, %v1478_v6  ;;  %v1474_v23 = vand.u32 4294901760, %v1473_v11 }
  0xca   : > { %1457 = vmatpush.msra.mxu3 %v1456_v32  ;;  %1372 = vmatpush.msra.mxu2 %v3057_v49 }
  0xcb   : > { %1298 = vmatpush.msra.mxu0 %v3427_v58  ;;  %1331 = vmatpush.msra.mxu1 %v2831_v27  ;;  %v1480_v37 = vand.u32 4294901760, %v1479_v39  ;;  %v3430_v27 = vld [vmem:[#allocation12_spill] sm:$0xff] }
  0xcc   : > { %1463 = vmatpush.msra.mxu3 %v1462_v51  ;;  %1041 = vmatmul.f32.vlgmr.msrb.gmra.mxu0 %v2651_v21  ;;  %v3429_v21 = vand.u32 4294901760, %v2906_v35 }
  0xcd   : > { %1302 = vmatpush.msra.mxu0 %v3428_v30  ;;  %1333 = vmatpush.msra.mxu1 %v2842_v62  ;;  %v3431_v62 = vld [vmem:[#allocation20_spill] sm:$0xff] }
  0xce   : > { %1374 = vmatpush.msra.mxu2 %v3070_v61  ;;  %1469 = vmatpush.msra.mxu3 %v1468_v31 }
  0xcf   : > { %1489 = vmatpush.msrb.mxu0 %v2906_v35  ;;  %1196 = vmatmul.f32.vlgmr.msrb.gmra.mxu2 %v2628_v22  ;;  %v3432_v22 = vand.u32 4294901760, %v2925_v53  ;;  %v3435_v35 = vld [vmem:[#allocation16_spill] sm:$0xff] }
  0xd0   : > { %1335 = vmatpush.msra.mxu1 %v2854_v4  ;;  %1376 = vmatpush.msra.mxu2 %v3089_v29  ;;  %v3433_v4 = vld [vmem:[#allocation13_spill] sm:$0xff] }
  0xd1   : > { %1492 = vmatpush.msrb.mxu0 %v2925_v53  ;;  %1475 = vmatpush.msra.mxu3 %v1474_v23  ;;  %v3437_v53 = vand.u32 4294901760, %v2945_v10 }
  0xd2   : > { %1235 = vmatmul.f32.vlgmr.msrb.gmra.mxu3 %v2635_v24  ;;  %1583 = vmatpush.msrb.mxu2 %v3429_v21  ;;  %v3434_v24 = vand.u32 4294901760, %v2938_v41 }
  0xd3   : > { %1495 = vmatpush.msrb.mxu0 %v2938_v41  ;;  %1337 = vmatpush.msra.mxu1 %v3430_v27  ;;  %v3439_v41 = vand.u32 4294901760, %v2957_v25 }
  0xd4   : > { %1481 = vmatpush.msra.mxu3 %v1480_v37  ;;  %1142 = vmatmul.f32.vlgmr.msrb.gmra.mxu1 %v3431_v62 }
  0xd5   : > { %1498 = vmatpush.msrb.mxu0 %v2945_v10  ;;  %1587 = vmatpush.msrb.mxu2 %v3432_v22  ;;  %v3440_v10 = vand.u32 4294901760, %v2976_v57 }
  0xd6   : > { %1650 = vmatpush.msrb.mxu3 %v3433_v4  ;;  %1339 = vmatpush.msra.mxu1 %v2886_v38  ;;  %v3438_v38 = vld [vmem:[#allocation21_spill] sm:$0xff] }
  0xd7   : > { %1501 = vmatpush.msrb.mxu0 %v2957_v25  ;;  %1591 = vmatpush.msrb.mxu2 %v3434_v24 }
  0xd8   : > { %1542 = vmatpush.msrb.mxu1 %v3433_v4  ;;  %1652 = vmatpush.msrb.mxu3 %v3435_v35 }
  0xd9   : > { %1382 = vmatmul.f32.vlgmr.msra.gmra.mxu2 %v3436_v63  ;;  %1504 = vmatpush.msrb.mxu0 %v2976_v57  ;;  %v3443_v57 = vld [vmem:[#allocation23_spill] sm:$0xff] }
  0xda   : > { %1544 = vmatpush.msrb.mxu1 %v3435_v35  ;;  %1595 = vmatpush.msrb.mxu2 %v3437_v53 }
  0xdb   : > { %1654 = vmatpush.msrb.mxu3 %v2913_v48  ;;  %1304 = vmatmul.f32.vlgmr.msra.gmra.mxu0 %v3431_v62 }
  0xdc   : > { %1483 = vmatmul.f32.vlgmr.msra.gmra.mxu3 %v3438_v38  ;;  %1507 = vmatpush.msrb.mxu0 %v2989_v20  ;;  %v3442_v20 = vld [vmem:[#allocation22_spill] sm:$0xff] }
  0xdd   : > { %1546 = vmatpush.msrb.mxu1 %v2913_v48  ;;  %1599 = vmatpush.msrb.mxu2 %v3439_v41 }
  0xde   : > { %1656 = vmatpush.msrb.mxu3 %v2920_v47  ;;  %1341 = vmatmul.f32.vlgmr.msra.gmra.mxu1 %v3431_v62 }
  0xdf   : > { %1510 = vmatpush.msrb.mxu0 %v3002_v60  ;;  %1548 = vmatpush.msrb.mxu1 %v2920_v47  ;;  %v3441_v47 = vand.u32 4294901760, %v3002_v60 }
  0xe0   : > { %1603 = vmatpush.msrb.mxu2 %v3440_v10  ;;  %1658 = vmatpush.msrb.mxu3 %v2932_v28 }
  0xe1   : > { %1513 = vmatpush.msrb.mxu0 %v3014_v36  ;;  %1550 = vmatpush.msrb.mxu1 %v2932_v28 }
  0xe2   : > { %1607 = vmatpush.msrb.mxu2 %v1424_v59  ;;  %1660 = vmatpush.msrb.mxu3 %v2950_v13 }
  0xe3   : > { %1516 = vmatpush.msrb.mxu0 %v3027_v52  ;;  %1552 = vmatpush.msrb.mxu1 %v2950_v13 }
  0xe4   : > { %1611 = vmatpush.msrb.mxu2 %v3441_v47  ;;  %1662 = vmatpush.msrb.mxu3 %v2965_v43 }
  0xe5   : > { %1519 = vmatpush.msrb.mxu0 %v3040_v54  ;;  %1554 = vmatpush.msrb.mxu1 %v2965_v43 }
  0xe6   : > { %1615 = vmatpush.msrb.mxu2 %v1436_v15  ;;  %1664 = vmatpush.msrb.mxu3 %v2978_v1 }
  0xe7   : > { %1522 = vmatpush.msrb.mxu0 %v3053_v44  ;;  %1556 = vmatpush.msrb.mxu1 %v2978_v1 }
  0xe8   : > { %1619 = vmatpush.msrb.mxu2 %v1442_v55  ;;  %1666 = vmatpush.msrb.mxu3 %v2991_v17 }
  0xe9   : > { %1525 = vmatpush.msrb.mxu0 %v3066_v5  ;;  %1558 = vmatpush.msrb.mxu1 %v2991_v17  ;;  %v461_v1 = vpop.f32.mrf.mxu1 }
  0xea   : > { %1623 = vmatpush.msrb.mxu2 %v1448_v26  ;;  %1668 = vmatpush.msrb.mxu3 %v3004_v42  ;;  %v360_v28 = vpop.f32.mrf.mxu0 }
  0xeb   : > { %1528 = vmatpush.msrb.mxu0 %v3081_v18  ;;  %1560 = vmatpush.msrb.mxu1 %v3004_v42  ;;  %v462_v42 = vadd.f32 %v461_v1, %v360_v28 }
  0xec   : > { %1627 = vmatpush.msrb.mxu2 %v1454_v16  ;;  %1670 = vmatpush.msrb.mxu3 %v3016_v40  ;;  %v515_v48 = vpop.f32.mrf.mxu2 }
  0xed   : > { %1531 = vmatpush.msrb.mxu0 %v3094_v46  ;;  %1562 = vmatpush.msrb.mxu1 %v3016_v40  ;;  %v554_v13 = vpop.f32.mrf.mxu3  ;;  %v516_v43 = vadd.f32 %v515_v48, %v462_v42 }
  0xee   : > { %1631 = vmatpush.msrb.mxu2 %v1460_v9  ;;  %1672 = vmatpush.msrb.mxu3 %v3029_v56 }
  0xef   : > { %1534 = vmatpush.msrb.mxu0 %v3110_v50  ;;  %1564 = vmatpush.msrb.mxu1 %v3029_v56  ;;  %v555_v60 = vadd.f32 %v554_v13, %v516_v43 }
  0xf0   : > { %1635 = vmatpush.msrb.mxu2 %v1466_v0  ;;  %1674 = vmatpush.msrb.mxu3 %v3042_v12 }
  0xf1   : > { %1537 = vmatmul.f32.vlgmr.msrb.gmra.mxu0 %v3442_v20  ;;  %1566 = vmatpush.msrb.mxu1 %v3042_v12 }
  0xf2   : > { %1639 = vmatpush.msrb.mxu2 %v1472_v34  ;;  %1676 = vmatpush.msrb.mxu3 %v3057_v49 }
  0xf3   : > { %1568 = vmatpush.msrb.mxu1 %v3057_v49  ;;  %v623_v17 = vpop.f32.mrf.mxu0 }
  0xf4   : > { %1643 = vmatpush.msrb.mxu2 %v1478_v6  ;;  %1678 = vmatpush.msrb.mxu3 %v3070_v61  ;;  %v660_v25 = vpop.f32.mrf.mxu1  ;;  %v701_v40 = vpop.f32.mrf.mxu2  ;;  %v624_v52 = vadd.f32 %v623_v17, %v555_v60 }
  0xf5   : > { %1645 = vmatmul.f32.vlgmr.msrb.gmra.mxu2 %v3438_v38  ;;  %1570 = vmatpush.msrb.mxu1 %v3070_v61 }
  0xf6   : > { %1680 = vmatpush.msrb.mxu3 %v3089_v29  ;;  %v661_v54 = vadd.f32 %v660_v25, %v624_v52 }
  0xf7   : > { %1682 = vmatmul.f32.vlgmr.msrb.gmra.mxu3 %v3438_v38  ;;  %1572 = vmatpush.msrb.mxu1 %v3089_v29  ;;  %v802_v59 = vpop.f32.mrf.mxu3 }
  0xf8   : > { %1576 = vmatmul.f32.vlgmr.msrb.gmra.mxu1 %v3443_v57  ;;  %v702_v44 = vadd.f32 %v701_v40, %v661_v54 }
  0xfa   : > { %v803_v61 = vadd.f32 %v802_v59, %v702_v44 }
 0x10b   : > { %v856_v56 = vpop.f32.mrf.mxu0 }
 0x10c   : > { %v857_v18 = vadd.f32 %v856_v56, %v803_v61 }
 0x111   : > { %v895_v36 = vpop.f32.mrf.mxu1  ;;  %v964_v15 = vpop.f32.mrf.mxu2 }
 0x112   : > { %v896_v29 = vadd.f32 %v895_v36, %v857_v18 }
 0x114   : > { %v1001_v12 = vpop.f32.mrf.mxu3  ;;  %v965_v14 = vadd.f32 %v964_v15, %v896_v29 }
 0x116   : > { %v1002_v45 = vadd.f32 %v1001_v12, %v965_v14 }
 0x118   : > { %v1856_v34 = vmul.f32 -1.442695, %v1002_v45 }
 0x11a   : > { %1938 = vpow2.f32 %v1856_v34 }
 0x120   : > { %v1939_v58 = vpop.eup %1938 }
 0x121   : > { %v1692_v39 = vadd.f32 1.0, %v1939_v58 }
 0x123   : > { %1940 = vrcp.f32 %v1692_v39  ;;  %vm1699_vm5 = vweird.f32 %v1692_v39  ;;  %v1705_v57 = vand.u32 2147483648, %v1692_v39  ;;  %v1703_v28 = vand.u32 2147483647, %v1692_v39 }
 0x125   : > { %v1706_v25 = vor.u32 1.1754944e-38, %v1705_v57  ;;  %vm1704_vm10 = vcmp.eq.f32.partialorder %v1703_v28, 8.507059e+37 }
 0x129   : > { %v1941_v27 = vpop.eup %1940 }
 0x12a   : > { %v1695_v4 = vmul.f32 %v1941_v27, %v1692_v39  ;;  %vm1700_vm3 = vweird.f32 %v1941_v27 }
 0x12b   : > { %vm1701_vm7 = vmor %vm1699_vm5, %vm1700_vm3 }
 0x12c   : > { %v1696_v24 = vsub.f32 1.0, %v1695_v4 }
 0x12e   : > { %v1697_v63 = vmul.f32 %v1941_v27, %v1696_v24 }
 0x130   : > { %v1698_v20 = vadd.f32 %v1941_v27, %v1697_v63 }
 0x132   : > { %v1702_v42 = vsel %vm1701_vm7, %v1941_v27, %v1698_v20 }
 0x133   : > { %v1707_v40 = vsel %vm1704_vm10, %v1706_v25, %v1702_v42 }
 0x149   : > { %v1042_v49 = vpop.f32.mrf.mxu0 }
 0x151   : > { %v1143_v55 = vpop.f32.mrf.mxu1 }
 0x152   : > { %v1144_v26 = vadd.f32 %v1143_v55, %v1042_v49  ;;  %v1197_v5 = vpop.f32.mrf.mxu2 }
 0x154   : > { %v1198_v16 = vadd.f32 %v1197_v5, %v1144_v26 }
 0x155   : > { %v1236_v9 = vpop.f32.mrf.mxu3 }
 0x156   : > { %v1237_v46 = vadd.f32 %v1236_v9, %v1198_v16 }
 0x158   : > { %v1305_v19 = vpop.f32.mrf.mxu0 }
 0x159   : > { %v1306_v0 = vadd.f32 %v1305_v19, %v1237_v46 }
 0x15b   : > { %v1342_v7 = vpop.f32.mrf.mxu1 }
 0x15c   : > { %v1343_v33 = vadd.f32 %v1342_v7, %v1306_v0  ;;  %v1383_v50 = vpop.f32.mrf.mxu2 }
 0x15e   : > { %v1384_v8 = vadd.f32 %v1383_v50, %v1343_v33 }
 0x15f   : > { %v1484_v32 = vpop.f32.mrf.mxu3 }
 0x160   : > { %v1485_v2 = vadd.f32 %v1484_v32, %v1384_v8 }
 0x16e   : > { %v1538_v3 = vpop.f32.mrf.mxu0 }
 0x16f   : > { %v1539_v51 = vadd.f32 %v1538_v3, %v1485_v2 }
 0x175   : > { %v1577_v6 = vpop.f32.mrf.mxu1 }
 0x176   : > { %v1578_v11 = vadd.f32 %v1577_v6, %v1539_v51 }
 0x178   : > { %v1646_v31 = vpop.f32.mrf.mxu2 }
 0x179   : > { %v1647_v30 = vadd.f32 %v1646_v31, %v1578_v11 }
 0x17a   : > { %v1683_v23 = vpop.f32.mrf.mxu3 }
 0x17b   : > { %v1684_v37 = vadd.f32 %v1683_v23, %v1647_v30 }
 0x17d   : > { %v1857_v21 = vmul.f32 -1.442695, %v1684_v37 }
 0x17f   : > { %1942 = vpow2.f32 %v1857_v21 }
 0x185   : > { %v1943_v62 = vpop.eup %1942 }
 0x186   : > { %v1693_v22 = vadd.f32 1.0, %v1943_v62 }
 0x188   : > { %1944 = vrcp.f32 %v1693_v22  ;;  %v1720_v41 = vand.u32 2147483648, %v1693_v22  ;;  %v1718_v47 = vand.u32 2147483647, %v1693_v22  ;;  %vm1714_vm6 = vweird.f32 %v1693_v22 }
 0x18a   : > { %v1721_v48 = vor.u32 1.1754944e-38, %v1720_v41  ;;  %vm1719_vm9 = vcmp.eq.f32.partialorder %v1718_v47, 8.507059e+37 }
 0x18e   : > { %v1945_v35 = vpop.eup %1944 }
 0x18f   : > { %v1710_v53 = vmul.f32 %v1945_v35, %v1693_v22  ;;  %vm1715_vm4 = vweird.f32 %v1945_v35 }
 0x190   : > { %vm1716_vm8 = vmor %vm1714_vm6, %vm1715_vm4 }
 0x191   : > { %v1711_v38 = vsub.f32 1.0, %v1710_v53 }
 0x193   : > { %v1712_v10 = vmul.f32 %v1945_v35, %v1711_v38 }
 0x195   : > { %v1713_v1 = vadd.f32 %v1945_v35, %v1712_v10 }
 0x197   : > { %v1717_v13 = vsel %vm1716_vm8, %v1945_v35, %v1713_v1 }
 0x198   : > { %v1722_v43 = vsel %vm1719_vm9, %v1721_v48, %v1717_v13 }
 0x199   : > { %v1726_v17 = vrot.slane %v1722_v43, 7 }
 0x19b   : > { %v1728_v60 = vsel %vm224_vm1, %v1707_v40, %v1726_v17 }
 0x19c   : > { %1734 = vst.msk [vmem:[%s194_s12] sm:$0x3] %vm2552_vm2, %v1728_v60 }
 0x19d   : > { %2033 = shalt.err (!%p2030_p13)
}
 0x19e   : > { %1869 = dma.vmem_to_hbm [thread:$0]  (%p2183_p4), %s1749_s7, 32, %s1751_s8, %s1736_s17  }
 0x19f PF: > { %s1762_s24 = sand.u32 1, %s2072_s9   ;;  %p1880_p0 = pnand %p1848_p6, %p2191_p7 }
 0x1a0   : > { %s1763_s27 = scalar_lea.sflag [#allocation5], %s1762_s24 }
 0x1a1   : > { %p1881_p2 = pneg %p1880_p0 }
 0x1a3   : > { %2067 = dma.done.wait (%p1881_p2), %s1763_s27, 32  }
 0x1a4   : > { %2069 = vsyncadd (%p1881_p2), %s1763_s27, 4294967264  ;;  %s19_s14 = sadd.s32 1, %s2092_s14   ;;  %s3445_s9 = smov %s2076_s10 }
 0x1a5   : > { %p16_p5 = scmp.ge.s32.totalorder %s19_s14, 4   ;;  %s3446_s10 = smov %s2080_s11 }
 0x1a6   : > { %s3447_s11 = smov %s2189_s4  ;;  %s3448_s12 = smov %s2088_s13 }
 0x1a7   : > { %s3449_s13 = smov %s3451_s26  ;;  %18 = sbr.rel (!%p16_p5) target bundleno = 7 (0x7), region = 90 }
 0x1ac   :  { %1769 = vsyncpa [#allocation4], 1 }
 0x1ad   :  { %1771 = vsyncpa [#allocation4 + $0x1], 1 }
 0x1ae   :  { %1772 = vsyncpa [#allocation7], 1 }
 0x1af   :  { %1774 = vsyncpa [#allocation7 + $0x1], 1 }
 0x1b0   :  { %1775 = vsyncpa [#allocation5], 1 }
 0x1b1   :  { %1777 = vsyncpa [#allocation5 + $0x1], 1 }

</bundles_post_ra>
